<compile_context>
chip_gen: v6e
topology: v6e:2x2x1
jax: 0.10.0
libtpu: 0.0.40
codegen_flags: <defaults>
</compile_context>

<pallas_src>
import functools

import jax
import jax.numpy as jnp
from jax import lax
from jax.experimental import pallas as pl
from jax.experimental.pallas import tpu as pltpu


def _round_up(x, m):
    return (x + m - 1) // m * m


def _rnn_kernel(layer_num, T, Bp, Hp, *refs):
    """Kernel body.

    refs = (x_ref,                               # (T, Bp, Dp) f32
            [w_ih_t, w_hh_t, b] * layer_num,     # bf16, bf16, f32(1,Hp)
            fc_w_t, fc_b,                        # (Hp,128) f32, (1,128) f32
            out_ref,                             # (Bp, 128) f32
            seq_ref, proj_ref)                   # VMEM scratch (T, Bp, Hp) f32
    """
    n_in = 1 + 3 * layer_num + 2
    x_ref = refs[0]
    param_refs = refs[1:n_in]
    out_ref = refs[n_in]
    seq_ref = refs[n_in + 1]
    proj_ref = refs[n_in + 2]

    h_last = None
    for l in range(layer_num):
        w_ih_t = param_refs[3 * l + 0][...]      # (D_l_pad, Hp) bf16
        w_hh_t = param_refs[3 * l + 1][...]      # (Hp, Hp)      bf16
        b = param_refs[3 * l + 2][...]           # (1, Hp)       f32 (b_ih + b_hh)

        # --- hoisted input projection: all T steps in one MXU matmul ---
        if l == 0:
            inp_flat = x_ref[...].reshape(T * Bp, x_ref.shape[-1])
        else:
            inp_flat = seq_ref[...].reshape(T * Bp, Hp)
        proj = jnp.dot(inp_flat.astype(jnp.bfloat16), w_ih_t,
                       preferred_element_type=jnp.float32) + b
        proj_ref[...] = proj.reshape(T, Bp, Hp)

        is_top = (l == layer_num - 1)

        def step(t, h, w_hh_t=w_hh_t, is_top=is_top):
            pre = proj_ref[t] + jnp.dot(h.astype(jnp.bfloat16), w_hh_t,
                                        preferred_element_type=jnp.float32)
            h_new = jnp.tanh(pre)                # (Bp, Hp) f32
            if not is_top:
                seq_ref[t] = h_new               # only lower layers need the sequence
            return h_new

        h0 = jnp.zeros((Bp, Hp), jnp.float32)
        h_last = lax.fori_loop(0, T, step, h0, unroll=True)

    # fc1 on the last hidden state (lane-padded to 128 for an unmasked store)
    fc_w_t = param_refs[3 * layer_num + 0][...]  # (Hp, 128) f32 (only col 0 nonzero)
    fc_b = param_refs[3 * layer_num + 1][...]    # (1, 128)  f32
    out_ref[...] = jnp.dot(h_last, fc_w_t, preferred_element_type=jnp.float32) + fc_b


def rnn_model_forward(x_btd, params, layer_num):
    """x_btd: (B, T, D_in) float32, batch_first like PyTorch. Returns (B, 1)."""
    B, T, D_in = x_btd.shape
    H = params["w_hh"][0].shape[0]

    Bp = _round_up(B, 8)          # sublane multiple
    Hp = _round_up(H, 128)        # lane multiple
    Dp = _round_up(D_in, 128)

    # time-major + pad: (B, T, D) -> (T, Bp, Dp)
    x_tbd = jnp.transpose(x_btd, (1, 0, 2)).astype(jnp.float32)
    x_pad = jnp.zeros((T, Bp, Dp), jnp.float32).at[:, :B, :D_in].set(x_tbd)

    inputs = [x_pad]
    for l in range(layer_num):
        d_l = D_in if l == 0 else H
        d_l_pad = Dp if l == 0 else Hp
        w_ih_t = (jnp.zeros((d_l_pad, Hp), jnp.float32)
                  .at[:d_l, :H].set(params["w_ih"][l].T).astype(jnp.bfloat16))
        w_hh_t = (jnp.zeros((Hp, Hp), jnp.float32)
                  .at[:H, :H].set(params["w_hh"][l].T).astype(jnp.bfloat16))
        b = (jnp.zeros((1, Hp), jnp.float32)
             .at[0, :H].set(params["b_ih"][l] + params["b_hh"][l]))
        inputs += [w_ih_t, w_hh_t, b]

    fc_w_t = jnp.zeros((Hp, 128), jnp.float32).at[:H, 0].set(params["fc_w"][0])
    fc_b = jnp.full((1, 128), params["fc_b"][0], jnp.float32)
    inputs += [fc_w_t, fc_b]

    # batch-block grid ("parallel" -> shards across TensorCores on v7x)
    bB = 8
    grid = (Bp // bB,)

    def _full_spec(shape):
        nd = len(shape)
        return pl.BlockSpec(shape, lambda i, nd=nd: (0,) * nd)

    in_specs = [pl.BlockSpec((T, bB, Dp), lambda i: (0, i, 0))]
    in_specs += [_full_spec(a.shape) for a in inputs[1:]]
    out_spec = pl.BlockSpec((bB, 128), lambda i: (i, 0))

    kern = functools.partial(_rnn_kernel, layer_num, T, bB, Hp)

    out_pad = pl.pallas_call(
        kern,
        out_shape=jax.ShapeDtypeStruct((Bp, 128), jnp.float32),
        grid=grid,
        in_specs=in_specs,
        out_specs=out_spec,
        scratch_shapes=[pltpu.VMEM((T, bB, Hp), jnp.float32),   # seq (lower layers)
                        pltpu.VMEM((T, bB, Hp), jnp.float32)],  # hoisted projections
        compiler_params=pltpu.CompilerParams(
            dimension_semantics=("parallel",)),
    )(*inputs)

    return out_pad[:B, :1]


def rnn_model_reference(x_btd, params, layer_num):
    """Pure-JAX f32 reference mirroring nn.RNN(tanh) + Linear on last step."""
    B, T, _ = x_btd.shape
    H = params["w_hh"][0].shape[0]
    inp = x_btd.astype(jnp.float32)
    for l in range(layer_num):
        h = jnp.zeros((B, H), jnp.float32)
        outs = []
        for t in range(T):
            h = jnp.tanh(inp[:, t, :] @ params["w_ih"][l].T + params["b_ih"][l]
                         + h @ params["w_hh"][l].T + params["b_hh"][l])
            outs.append(h)
        inp = jnp.stack(outs, axis=1)
    return inp[:, -1, :] @ params["fc_w"].T + params["fc_b"]


def init_params(key, layer_num, n_input, n_filter):
    """Deterministic synthetic parameters with the same shapes as the PyTorch module."""
    params = {"w_ih": [], "w_hh": [], "b_ih": [], "b_hh": []}
    for l in range(layer_num):
        d_l = n_input if l == 0 else n_filter
        key, k1, k2, k3, k4 = jax.random.split(key, 5)
        params["w_ih"].append(0.1 * jax.random.normal(k1, (n_filter, d_l), jnp.float32))
        params["w_hh"].append(0.1 * jax.random.normal(k2, (n_filter, n_filter), jnp.float32))
        params["b_ih"].append(0.1 * jax.random.normal(k3, (n_filter,), jnp.float32))
        params["b_hh"].append(0.1 * jax.random.normal(k4, (n_filter,), jnp.float32))
    key, k5, k6 = jax.random.split(key, 3)
    params["fc_w"] = 0.1 * jax.random.normal(k5, (1, n_filter), jnp.float32)   # Linear(n_filter, 1)
    params["fc_b"] = 0.1 * jax.random.normal(k6, (1,), jnp.float32)
    return params


if __name__ == "__main__":
    layer_num = 2
    n_input = 16      # feature dim per time step
    n_filter = 32     # hidden size
    B, T = 2, 8

    key = jax.random.PRNGKey(0)
    key, kx, kp = jax.random.split(key, 3)
    x = jax.random.normal(kx, (B, T, n_input), jnp.float32)
    params = init_params(kp, layer_num, n_input, n_filter)

    out = rnn_model_forward(x, params, layer_num)
    out = jax.block_until_ready(out)

    ref = rnn_model_reference(x, params, layer_num)
    assert out.shape == (B, 1), out.shape
    assert jnp.allclose(out, ref, atol=1e-2, rtol=1e-2), (out, ref)

    print("KERNEL_OK")
</pallas_src>

<mosaic_0001>
module attributes {stable_mosaic.version = 11 : i64} {
  func.func @_rnn_kernel(%arg0: i32, %arg1: memref<8x8x128xf32, #tpu.memory_space<vmem>>, %arg2: memref<128x128xbf16, #tpu.memory_space<vmem>>, %arg3: memref<128x128xbf16, #tpu.memory_space<vmem>>, %arg4: memref<1x128xf32, #tpu.memory_space<vmem>>, %arg5: memref<128x128xbf16, #tpu.memory_space<vmem>>, %arg6: memref<128x128xbf16, #tpu.memory_space<vmem>>, %arg7: memref<1x128xf32, #tpu.memory_space<vmem>>, %arg8: memref<128x128xf32, #tpu.memory_space<vmem>>, %arg9: memref<1x128xf32, #tpu.memory_space<vmem>>, %arg10: memref<8x128xf32, #tpu.memory_space<vmem>>, %arg11: memref<8x8x128xf32, #tpu.memory_space<vmem>>, %arg12: memref<8x8x128xf32, #tpu.memory_space<vmem>>) attributes {dimension_semantics = [#tpu.dimension_semantics<parallel>], iteration_bounds = array<i64: 1>, scalar_prefetch = 0 : i64, scratch_operands = 2 : i64, tpu.core_type = #tpu.core_type<tc>, window_params = [{transform_indices = @transform_0, window_bounds = array<i64: 8, 8, 128>}, {pipeline_mode = #tpu.pipeline_mode<synchronous>, transform_indices = @transform_1, window_bounds = array<i64: 128, 128>}, {pipeline_mode = #tpu.pipeline_mode<synchronous>, transform_indices = @transform_2, window_bounds = array<i64: 128, 128>}, {pipeline_mode = #tpu.pipeline_mode<synchronous>, transform_indices = @transform_3, window_bounds = array<i64: 1, 128>}, {pipeline_mode = #tpu.pipeline_mode<synchronous>, transform_indices = @transform_4, window_bounds = array<i64: 128, 128>}, {pipeline_mode = #tpu.pipeline_mode<synchronous>, transform_indices = @transform_5, window_bounds = array<i64: 128, 128>}, {pipeline_mode = #tpu.pipeline_mode<synchronous>, transform_indices = @transform_6, window_bounds = array<i64: 1, 128>}, {pipeline_mode = #tpu.pipeline_mode<synchronous>, transform_indices = @transform_7, window_bounds = array<i64: 128, 128>}, {pipeline_mode = #tpu.pipeline_mode<synchronous>, transform_indices = @transform_8, window_bounds = array<i64: 1, 128>}, {transform_indices = @transform_9, window_bounds = array<i64: 8, 128>}]} {
    %c0 = arith.constant 0 : index
    %c0_0 = arith.constant 0 : index
    %0 = vector.load %arg2[%c0, %c0_0] : memref<128x128xbf16, #tpu.memory_space<vmem>>, vector<128x128xbf16>
    %c0_1 = arith.constant 0 : index
    %c0_2 = arith.constant 0 : index
    %1 = vector.load %arg3[%c0_1, %c0_2] : memref<128x128xbf16, #tpu.memory_space<vmem>>, vector<128x128xbf16>
    %c0_3 = arith.constant 0 : index
    %c0_4 = arith.constant 0 : index
    %2 = vector.load %arg4[%c0_3, %c0_4] : memref<1x128xf32, #tpu.memory_space<vmem>>, vector<1x128xf32>
    %c0_5 = arith.constant 0 : index
    %c0_6 = arith.constant 0 : index
    %c0_7 = arith.constant 0 : index
    %3 = vector.load %arg1[%c0_5, %c0_6, %c0_7] : memref<8x8x128xf32, #tpu.memory_space<vmem>>, vector<8x8x128xf32>
    %4 = vector.shape_cast %3 : vector<8x8x128xf32> to vector<64x128xf32>
    %5 = arith.truncf %4 : vector<64x128xf32> to vector<64x128xbf16>
    %cst = arith.constant dense<0.000000e+00> : vector<64x128xf32>
    %6 = tpu.matmul %5, %0, %cst {dimension_numbers = #tpu.dot_dimension_numbers<[1], [0], [0], [1], [0, 0, 1, 1], [], []>} : vector<64x128xbf16>, vector<128x128xbf16>, vector<64x128xf32> -> vector<64x128xf32>
    %7 = vector.broadcast %2 : vector<1x128xf32> to vector<64x128xf32>
    %8 = arith.addf %6, %7 : vector<64x128xf32>
    %9 = vector.shape_cast %8 : vector<64x128xf32> to vector<8x8x128xf32>
    %c0_8 = arith.constant 0 : index
    %c0_9 = arith.constant 0 : index
    %c0_10 = arith.constant 0 : index
    %10 = vector.load %arg12[%c0_8, %c0_9, %c0_10] : memref<8x8x128xf32, #tpu.memory_space<vmem>>, vector<8x8x128xf32>
    tpu.vector_store %arg12[%c0_8, %c0_9, %c0_10], %9 {strides = array<i32>} : memref<8x8x128xf32, #tpu.memory_space<vmem>>, vector<8x8x128xf32>,
    %cst_11 = arith.constant 0.000000e+00 : f32
    %11 = vector.broadcast %cst_11 : f32 to vector<8x128xf32>
    %c0_i32 = arith.constant 0 : i32
    %12 = arith.index_cast %c0_i32 : i32 to index
    %c0_12 = arith.constant 0 : index
    %c0_13 = arith.constant 0 : index
    %13 = vector.load %arg12[%12, %c0_12, %c0_13] : memref<8x8x128xf32, #tpu.memory_space<vmem>>, vector<1x8x128xf32>
    %14 = vector.shape_cast %13 : vector<1x8x128xf32> to vector<8x128xf32>
    %15 = arith.truncf %11 : vector<8x128xf32> to vector<8x128xbf16>
    %cst_14 = arith.constant dense<0.000000e+00> : vector<8x128xf32>
    %16 = tpu.matmul %15, %1, %cst_14 {dimension_numbers = #tpu.dot_dimension_numbers<[1], [0], [0], [1], [0, 0, 1, 1], [], []>} : vector<8x128xbf16>, vector<128x128xbf16>, vector<8x128xf32> -> vector<8x128xf32>
    %17 = arith.addf %14, %16 : vector<8x128xf32>
    %18 = math.tanh %17 : vector<8x128xf32>
    %19 = arith.index_cast %c0_i32 : i32 to index
    %c0_15 = arith.constant 0 : index
    %c0_16 = arith.constant 0 : index
    %20 = vector.load %arg11[%19, %c0_15, %c0_16] : memref<8x8x128xf32, #tpu.memory_space<vmem>>, vector<1x8x128xf32>
    %21 = vector.shape_cast %20 : vector<1x8x128xf32> to vector<8x128xf32>
    %22 = vector.shape_cast %18 : vector<8x128xf32> to vector<1x8x128xf32>
    tpu.vector_store %arg11[%19, %c0_15, %c0_16], %22 {strides = array<i32>} : memref<8x8x128xf32, #tpu.memory_space<vmem>>, vector<1x8x128xf32>,
    %c1_i32 = arith.constant 1 : i32
    %23 = arith.index_cast %c1_i32 : i32 to index
    %c0_17 = arith.constant 0 : index
    %c0_18 = arith.constant 0 : index
    %24 = vector.load %arg12[%23, %c0_17, %c0_18] : memref<8x8x128xf32, #tpu.memory_space<vmem>>, vector<1x8x128xf32>
    %25 = vector.shape_cast %24 : vector<1x8x128xf32> to vector<8x128xf32>
    %26 = arith.truncf %18 : vector<8x128xf32> to vector<8x128xbf16>
    %cst_19 = arith.constant dense<0.000000e+00> : vector<8x128xf32>
    %27 = tpu.matmul %26, %1, %cst_19 {dimension_numbers = #tpu.dot_dimension_numbers<[1], [0], [0], [1], [0, 0, 1, 1], [], []>} : vector<8x128xbf16>, vector<128x128xbf16>, vector<8x128xf32> -> vector<8x128xf32>
    %28 = arith.addf %25, %27 : vector<8x128xf32>
    %29 = math.tanh %28 : vector<8x128xf32>
    %30 = arith.index_cast %c1_i32 : i32 to index
    %c0_20 = arith.constant 0 : index
    %c0_21 = arith.constant 0 : index
    %31 = vector.load %arg11[%30, %c0_20, %c0_21] : memref<8x8x128xf32, #tpu.memory_space<vmem>>, vector<1x8x128xf32>
    %32 = vector.shape_cast %31 : vector<1x8x128xf32> to vector<8x128xf32>
    %33 = vector.shape_cast %29 : vector<8x128xf32> to vector<1x8x128xf32>
    tpu.vector_store %arg11[%30, %c0_20, %c0_21], %33 {strides = array<i32>} : memref<8x8x128xf32, #tpu.memory_space<vmem>>, vector<1x8x128xf32>,
    %c2_i32 = arith.constant 2 : i32
    %34 = arith.index_cast %c2_i32 : i32 to index
    %c0_22 = arith.constant 0 : index
    %c0_23 = arith.constant 0 : index
    %35 = vector.load %arg12[%34, %c0_22, %c0_23] : memref<8x8x128xf32, #tpu.memory_space<vmem>>, vector<1x8x128xf32>
    %36 = vector.shape_cast %35 : vector<1x8x128xf32> to vector<8x128xf32>
    %37 = arith.truncf %29 : vector<8x128xf32> to vector<8x128xbf16>
    %cst_24 = arith.constant dense<0.000000e+00> : vector<8x128xf32>
    %38 = tpu.matmul %37, %1, %cst_24 {dimension_numbers = #tpu.dot_dimension_numbers<[1], [0], [0], [1], [0, 0, 1, 1], [], []>} : vector<8x128xbf16>, vector<128x128xbf16>, vector<8x128xf32> -> vector<8x128xf32>
    %39 = arith.addf %36, %38 : vector<8x128xf32>
    %40 = math.tanh %39 : vector<8x128xf32>
    %41 = arith.index_cast %c2_i32 : i32 to index
    %c0_25 = arith.constant 0 : index
    %c0_26 = arith.constant 0 : index
    %42 = vector.load %arg11[%41, %c0_25, %c0_26] : memref<8x8x128xf32, #tpu.memory_space<vmem>>, vector<1x8x128xf32>
    %43 = vector.shape_cast %42 : vector<1x8x128xf32> to vector<8x128xf32>
    %44 = vector.shape_cast %40 : vector<8x128xf32> to vector<1x8x128xf32>
    tpu.vector_store %arg11[%41, %c0_25, %c0_26], %44 {strides = array<i32>} : memref<8x8x128xf32, #tpu.memory_space<vmem>>, vector<1x8x128xf32>,
    %c3_i32 = arith.constant 3 : i32
    %45 = arith.index_cast %c3_i32 : i32 to index
    %c0_27 = arith.constant 0 : index
    %c0_28 = arith.constant 0 : index
    %46 = vector.load %arg12[%45, %c0_27, %c0_28] : memref<8x8x128xf32, #tpu.memory_space<vmem>>, vector<1x8x128xf32>
    %47 = vector.shape_cast %46 : vector<1x8x128xf32> to vector<8x128xf32>
    %48 = arith.truncf %40 : vector<8x128xf32> to vector<8x128xbf16>
    %cst_29 = arith.constant dense<0.000000e+00> : vector<8x128xf32>
    %49 = tpu.matmul %48, %1, %cst_29 {dimension_numbers = #tpu.dot_dimension_numbers<[1], [0], [0], [1], [0, 0, 1, 1], [], []>} : vector<8x128xbf16>, vector<128x128xbf16>, vector<8x128xf32> -> vector<8x128xf32>
    %50 = arith.addf %47, %49 : vector<8x128xf32>
    %51 = math.tanh %50 : vector<8x128xf32>
    %52 = arith.index_cast %c3_i32 : i32 to index
    %c0_30 = arith.constant 0 : index
    %c0_31 = arith.constant 0 : index
    %53 = vector.load %arg11[%52, %c0_30, %c0_31] : memref<8x8x128xf32, #tpu.memory_space<vmem>>, vector<1x8x128xf32>
    %54 = vector.shape_cast %53 : vector<1x8x128xf32> to vector<8x128xf32>
    %55 = vector.shape_cast %51 : vector<8x128xf32> to vector<1x8x128xf32>
    tpu.vector_store %arg11[%52, %c0_30, %c0_31], %55 {strides = array<i32>} : memref<8x8x128xf32, #tpu.memory_space<vmem>>, vector<1x8x128xf32>,
    %c4_i32 = arith.constant 4 : i32
    %56 = arith.index_cast %c4_i32 : i32 to index
    %c0_32 = arith.constant 0 : index
    %c0_33 = arith.constant 0 : index
    %57 = vector.load %arg12[%56, %c0_32, %c0_33] : memref<8x8x128xf32, #tpu.memory_space<vmem>>, vector<1x8x128xf32>
    %58 = vector.shape_cast %57 : vector<1x8x128xf32> to vector<8x128xf32>
    %59 = arith.truncf %51 : vector<8x128xf32> to vector<8x128xbf16>
    %cst_34 = arith.constant dense<0.000000e+00> : vector<8x128xf32>
    %60 = tpu.matmul %59, %1, %cst_34 {dimension_numbers = #tpu.dot_dimension_numbers<[1], [0], [0], [1], [0, 0, 1, 1], [], []>} : vector<8x128xbf16>, vector<128x128xbf16>, vector<8x128xf32> -> vector<8x128xf32>
    %61 = arith.addf %58, %60 : vector<8x128xf32>
    %62 = math.tanh %61 : vector<8x128xf32>
    %63 = arith.index_cast %c4_i32 : i32 to index
    %c0_35 = arith.constant 0 : index
    %c0_36 = arith.constant 0 : index
    %64 = vector.load %arg11[%63, %c0_35, %c0_36] : memref<8x8x128xf32, #tpu.memory_space<vmem>>, vector<1x8x128xf32>
    %65 = vector.shape_cast %64 : vector<1x8x128xf32> to vector<8x128xf32>
    %66 = vector.shape_cast %62 : vector<8x128xf32> to vector<1x8x128xf32>
    tpu.vector_store %arg11[%63, %c0_35, %c0_36], %66 {strides = array<i32>} : memref<8x8x128xf32, #tpu.memory_space<vmem>>, vector<1x8x128xf32>,
    %c5_i32 = arith.constant 5 : i32
    %67 = arith.index_cast %c5_i32 : i32 to index
    %c0_37 = arith.constant 0 : index
    %c0_38 = arith.constant 0 : index
    %68 = vector.load %arg12[%67, %c0_37, %c0_38] : memref<8x8x128xf32, #tpu.memory_space<vmem>>, vector<1x8x128xf32>
    %69 = vector.shape_cast %68 : vector<1x8x128xf32> to vector<8x128xf32>
    %70 = arith.truncf %62 : vector<8x128xf32> to vector<8x128xbf16>
    %cst_39 = arith.constant dense<0.000000e+00> : vector<8x128xf32>
    %71 = tpu.matmul %70, %1, %cst_39 {dimension_numbers = #tpu.dot_dimension_numbers<[1], [0], [0], [1], [0, 0, 1, 1], [], []>} : vector<8x128xbf16>, vector<128x128xbf16>, vector<8x128xf32> -> vector<8x128xf32>
    %72 = arith.addf %69, %71 : vector<8x128xf32>
    %73 = math.tanh %72 : vector<8x128xf32>
    %74 = arith.index_cast %c5_i32 : i32 to index
    %c0_40 = arith.constant 0 : index
    %c0_41 = arith.constant 0 : index
    %75 = vector.load %arg11[%74, %c0_40, %c0_41] : memref<8x8x128xf32, #tpu.memory_space<vmem>>, vector<1x8x128xf32>
    %76 = vector.shape_cast %75 : vector<1x8x128xf32> to vector<8x128xf32>
    %77 = vector.shape_cast %73 : vector<8x128xf32> to vector<1x8x128xf32>
    tpu.vector_store %arg11[%74, %c0_40, %c0_41], %77 {strides = array<i32>} : memref<8x8x128xf32, #tpu.memory_space<vmem>>, vector<1x8x128xf32>,
    %c6_i32 = arith.constant 6 : i32
    %78 = arith.index_cast %c6_i32 : i32 to index
    %c0_42 = arith.constant 0 : index
    %c0_43 = arith.constant 0 : index
    %79 = vector.load %arg12[%78, %c0_42, %c0_43] : memref<8x8x128xf32, #tpu.memory_space<vmem>>, vector<1x8x128xf32>
    %80 = vector.shape_cast %79 : vector<1x8x128xf32> to vector<8x128xf32>
    %81 = arith.truncf %73 : vector<8x128xf32> to vector<8x128xbf16>
    %cst_44 = arith.constant dense<0.000000e+00> : vector<8x128xf32>
    %82 = tpu.matmul %81, %1, %cst_44 {dimension_numbers = #tpu.dot_dimension_numbers<[1], [0], [0], [1], [0, 0, 1, 1], [], []>} : vector<8x128xbf16>, vector<128x128xbf16>, vector<8x128xf32> -> vector<8x128xf32>
    %83 = arith.addf %80, %82 : vector<8x128xf32>
    %84 = math.tanh %83 : vector<8x128xf32>
    %85 = arith.index_cast %c6_i32 : i32 to index
    %c0_45 = arith.constant 0 : index
    %c0_46 = arith.constant 0 : index
    %86 = vector.load %arg11[%85, %c0_45, %c0_46] : memref<8x8x128xf32, #tpu.memory_space<vmem>>, vector<1x8x128xf32>
    %87 = vector.shape_cast %86 : vector<1x8x128xf32> to vector<8x128xf32>
    %88 = vector.shape_cast %84 : vector<8x128xf32> to vector<1x8x128xf32>
    tpu.vector_store %arg11[%85, %c0_45, %c0_46], %88 {strides = array<i32>} : memref<8x8x128xf32, #tpu.memory_space<vmem>>, vector<1x8x128xf32>,
    %c7_i32 = arith.constant 7 : i32
    %89 = arith.index_cast %c7_i32 : i32 to index
    %c0_47 = arith.constant 0 : index
    %c0_48 = arith.constant 0 : index
    %90 = vector.load %arg12[%89, %c0_47, %c0_48] : memref<8x8x128xf32, #tpu.memory_space<vmem>>, vector<1x8x128xf32>
    %91 = vector.shape_cast %90 : vector<1x8x128xf32> to vector<8x128xf32>
    %92 = arith.truncf %84 : vector<8x128xf32> to vector<8x128xbf16>
    %cst_49 = arith.constant dense<0.000000e+00> : vector<8x128xf32>
    %93 = tpu.matmul %92, %1, %cst_49 {dimension_numbers = #tpu.dot_dimension_numbers<[1], [0], [0], [1], [0, 0, 1, 1], [], []>} : vector<8x128xbf16>, vector<128x128xbf16>, vector<8x128xf32> -> vector<8x128xf32>
    %94 = arith.addf %91, %93 : vector<8x128xf32>
    %95 = math.tanh %94 : vector<8x128xf32>
    %96 = arith.index_cast %c7_i32 : i32 to index
    %c0_50 = arith.constant 0 : index
    %c0_51 = arith.constant 0 : index
    %97 = vector.load %arg11[%96, %c0_50, %c0_51] : memref<8x8x128xf32, #tpu.memory_space<vmem>>, vector<1x8x128xf32>
    %98 = vector.shape_cast %97 : vector<1x8x128xf32> to vector<8x128xf32>
    %99 = vector.shape_cast %95 : vector<8x128xf32> to vector<1x8x128xf32>
    tpu.vector_store %arg11[%96, %c0_50, %c0_51], %99 {strides = array<i32>} : memref<8x8x128xf32, #tpu.memory_space<vmem>>, vector<1x8x128xf32>,
    %c8_i32 = arith.constant 8 : i32
    %c0_52 = arith.constant 0 : index
    %c0_53 = arith.constant 0 : index
    %100 = vector.load %arg5[%c0_52, %c0_53] : memref<128x128xbf16, #tpu.memory_space<vmem>>, vector<128x128xbf16>
    %c0_54 = arith.constant 0 : index
    %c0_55 = arith.constant 0 : index
    %101 = vector.load %arg6[%c0_54, %c0_55] : memref<128x128xbf16, #tpu.memory_space<vmem>>, vector<128x128xbf16>
    %c0_56 = arith.constant 0 : index
    %c0_57 = arith.constant 0 : index
    %102 = vector.load %arg7[%c0_56, %c0_57] : memref<1x128xf32, #tpu.memory_space<vmem>>, vector<1x128xf32>
    %c0_58 = arith.constant 0 : index
    %c0_59 = arith.constant 0 : index
    %c0_60 = arith.constant 0 : index
    %103 = vector.load %arg11[%c0_58, %c0_59, %c0_60] : memref<8x8x128xf32, #tpu.memory_space<vmem>>, vector<8x8x128xf32>
    %104 = vector.shape_cast %103 : vector<8x8x128xf32> to vector<64x128xf32>
    %105 = arith.truncf %104 : vector<64x128xf32> to vector<64x128xbf16>
    %cst_61 = arith.constant dense<0.000000e+00> : vector<64x128xf32>
    %106 = tpu.matmul %105, %100, %cst_61 {dimension_numbers = #tpu.dot_dimension_numbers<[1], [0], [0], [1], [0, 0, 1, 1], [], []>} : vector<64x128xbf16>, vector<128x128xbf16>, vector<64x128xf32> -> vector<64x128xf32>
    %107 = vector.broadcast %102 : vector<1x128xf32> to vector<64x128xf32>
    %108 = arith.addf %106, %107 : vector<64x128xf32>
    %109 = vector.shape_cast %108 : vector<64x128xf32> to vector<8x8x128xf32>
    %c0_62 = arith.constant 0 : index
    %c0_63 = arith.constant 0 : index
    %c0_64 = arith.constant 0 : index
    %110 = vector.load %arg12[%c0_62, %c0_63, %c0_64] : memref<8x8x128xf32, #tpu.memory_space<vmem>>, vector<8x8x128xf32>
    tpu.vector_store %arg12[%c0_62, %c0_63, %c0_64], %109 {strides = array<i32>} : memref<8x8x128xf32, #tpu.memory_space<vmem>>, vector<8x8x128xf32>,
    %cst_65 = arith.constant 0.000000e+00 : f32
    %111 = vector.broadcast %cst_65 : f32 to vector<8x128xf32>
    %c0_i32_66 = arith.constant 0 : i32
    %112 = arith.index_cast %c0_i32_66 : i32 to index
    %c0_67 = arith.constant 0 : index
    %c0_68 = arith.constant 0 : index
    %113 = vector.load %arg12[%112, %c0_67, %c0_68] : memref<8x8x128xf32, #tpu.memory_space<vmem>>, vector<1x8x128xf32>
    %114 = vector.shape_cast %113 : vector<1x8x128xf32> to vector<8x128xf32>
    %115 = arith.truncf %111 : vector<8x128xf32> to vector<8x128xbf16>
    %cst_69 = arith.constant dense<0.000000e+00> : vector<8x128xf32>
    %116 = tpu.matmul %115, %101, %cst_69 {dimension_numbers = #tpu.dot_dimension_numbers<[1], [0], [0], [1], [0, 0, 1, 1], [], []>} : vector<8x128xbf16>, vector<128x128xbf16>, vector<8x128xf32> -> vector<8x128xf32>
    %117 = arith.addf %114, %116 : vector<8x128xf32>
    %118 = math.tanh %117 : vector<8x128xf32>
    %c1_i32_70 = arith.constant 1 : i32
    %119 = arith.index_cast %c1_i32_70 : i32 to index
    %c0_71 = arith.constant 0 : index
    %c0_72 = arith.constant 0 : index
    %120 = vector.load %arg12[%119, %c0_71, %c0_72] : memref<8x8x128xf32, #tpu.memory_space<vmem>>, vector<1x8x128xf32>
    %121 = vector.shape_cast %120 : vector<1x8x128xf32> to vector<8x128xf32>
    %122 = arith.truncf %118 : vector<8x128xf32> to vector<8x128xbf16>
    %cst_73 = arith.constant dense<0.000000e+00> : vector<8x128xf32>
    %123 = tpu.matmul %122, %101, %cst_73 {dimension_numbers = #tpu.dot_dimension_numbers<[1], [0], [0], [1], [0, 0, 1, 1], [], []>} : vector<8x128xbf16>, vector<128x128xbf16>, vector<8x128xf32> -> vector<8x128xf32>
    %124 = arith.addf %121, %123 : vector<8x128xf32>
    %125 = math.tanh %124 : vector<8x128xf32>
    %c2_i32_74 = arith.constant 2 : i32
    %126 = arith.index_cast %c2_i32_74 : i32 to index
    %c0_75 = arith.constant 0 : index
    %c0_76 = arith.constant 0 : index
    %127 = vector.load %arg12[%126, %c0_75, %c0_76] : memref<8x8x128xf32, #tpu.memory_space<vmem>>, vector<1x8x128xf32>
    %128 = vector.shape_cast %127 : vector<1x8x128xf32> to vector<8x128xf32>
    %129 = arith.truncf %125 : vector<8x128xf32> to vector<8x128xbf16>
    %cst_77 = arith.constant dense<0.000000e+00> : vector<8x128xf32>
    %130 = tpu.matmul %129, %101, %cst_77 {dimension_numbers = #tpu.dot_dimension_numbers<[1], [0], [0], [1], [0, 0, 1, 1], [], []>} : vector<8x128xbf16>, vector<128x128xbf16>, vector<8x128xf32> -> vector<8x128xf32>
    %131 = arith.addf %128, %130 : vector<8x128xf32>
    %132 = math.tanh %131 : vector<8x128xf32>
    %c3_i32_78 = arith.constant 3 : i32
    %133 = arith.index_cast %c3_i32_78 : i32 to index
    %c0_79 = arith.constant 0 : index
    %c0_80 = arith.constant 0 : index
    %134 = vector.load %arg12[%133, %c0_79, %c0_80] : memref<8x8x128xf32, #tpu.memory_space<vmem>>, vector<1x8x128xf32>
    %135 = vector.shape_cast %134 : vector<1x8x128xf32> to vector<8x128xf32>
    %136 = arith.truncf %132 : vector<8x128xf32> to vector<8x128xbf16>
    %cst_81 = arith.constant dense<0.000000e+00> : vector<8x128xf32>
    %137 = tpu.matmul %136, %101, %cst_81 {dimension_numbers = #tpu.dot_dimension_numbers<[1], [0], [0], [1], [0, 0, 1, 1], [], []>} : vector<8x128xbf16>, vector<128x128xbf16>, vector<8x128xf32> -> vector<8x128xf32>
    %138 = arith.addf %135, %137 : vector<8x128xf32>
    %139 = math.tanh %138 : vector<8x128xf32>
    %c4_i32_82 = arith.constant 4 : i32
    %140 = arith.index_cast %c4_i32_82 : i32 to index
    %c0_83 = arith.constant 0 : index
    %c0_84 = arith.constant 0 : index
    %141 = vector.load %arg12[%140, %c0_83, %c0_84] : memref<8x8x128xf32, #tpu.memory_space<vmem>>, vector<1x8x128xf32>
    %142 = vector.shape_cast %141 : vector<1x8x128xf32> to vector<8x128xf32>
    %143 = arith.truncf %139 : vector<8x128xf32> to vector<8x128xbf16>
    %cst_85 = arith.constant dense<0.000000e+00> : vector<8x128xf32>
    %144 = tpu.matmul %143, %101, %cst_85 {dimension_numbers = #tpu.dot_dimension_numbers<[1], [0], [0], [1], [0, 0, 1, 1], [], []>} : vector<8x128xbf16>, vector<128x128xbf16>, vector<8x128xf32> -> vector<8x128xf32>
    %145 = arith.addf %142, %144 : vector<8x128xf32>
    %146 = math.tanh %145 : vector<8x128xf32>
    %c5_i32_86 = arith.constant 5 : i32
    %147 = arith.index_cast %c5_i32_86 : i32 to index
    %c0_87 = arith.constant 0 : index
    %c0_88 = arith.constant 0 : index
    %148 = vector.load %arg12[%147, %c0_87, %c0_88] : memref<8x8x128xf32, #tpu.memory_space<vmem>>, vector<1x8x128xf32>
    %149 = vector.shape_cast %148 : vector<1x8x128xf32> to vector<8x128xf32>
    %150 = arith.truncf %146 : vector<8x128xf32> to vector<8x128xbf16>
    %cst_89 = arith.constant dense<0.000000e+00> : vector<8x128xf32>
    %151 = tpu.matmul %150, %101, %cst_89 {dimension_numbers = #tpu.dot_dimension_numbers<[1], [0], [0], [1], [0, 0, 1, 1], [], []>} : vector<8x128xbf16>, vector<128x128xbf16>, vector<8x128xf32> -> vector<8x128xf32>
    %152 = arith.addf %149, %151 : vector<8x128xf32>
    %153 = math.tanh %152 : vector<8x128xf32>
    %c6_i32_90 = arith.constant 6 : i32
    %154 = arith.index_cast %c6_i32_90 : i32 to index
    %c0_91 = arith.constant 0 : index
    %c0_92 = arith.constant 0 : index
    %155 = vector.load %arg12[%154, %c0_91, %c0_92] : memref<8x8x128xf32, #tpu.memory_space<vmem>>, vector<1x8x128xf32>
    %156 = vector.shape_cast %155 : vector<1x8x128xf32> to vector<8x128xf32>
    %157 = arith.truncf %153 : vector<8x128xf32> to vector<8x128xbf16>
    %cst_93 = arith.constant dense<0.000000e+00> : vector<8x128xf32>
    %158 = tpu.matmul %157, %101, %cst_93 {dimension_numbers = #tpu.dot_dimension_numbers<[1], [0], [0], [1], [0, 0, 1, 1], [], []>} : vector<8x128xbf16>, vector<128x128xbf16>, vector<8x128xf32> -> vector<8x128xf32>
    %159 = arith.addf %156, %158 : vector<8x128xf32>
    %160 = math.tanh %159 : vector<8x128xf32>
    %c7_i32_94 = arith.constant 7 : i32
    %161 = arith.index_cast %c7_i32_94 : i32 to index
    %c0_95 = arith.constant 0 : index
    %c0_96 = arith.constant 0 : index
    %162 = vector.load %arg12[%161, %c0_95, %c0_96] : memref<8x8x128xf32, #tpu.memory_space<vmem>>, vector<1x8x128xf32>
    %163 = vector.shape_cast %162 : vector<1x8x128xf32> to vector<8x128xf32>
    %164 = arith.truncf %160 : vector<8x128xf32> to vector<8x128xbf16>
    %cst_97 = arith.constant dense<0.000000e+00> : vector<8x128xf32>
    %165 = tpu.matmul %164, %101, %cst_97 {dimension_numbers = #tpu.dot_dimension_numbers<[1], [0], [0], [1], [0, 0, 1, 1], [], []>} : vector<8x128xbf16>, vector<128x128xbf16>, vector<8x128xf32> -> vector<8x128xf32>
    %166 = arith.addf %163, %165 : vector<8x128xf32>
    %167 = math.tanh %166 : vector<8x128xf32>
    %c8_i32_98 = arith.constant 8 : i32
    %c0_99 = arith.constant 0 : index
    %c0_100 = arith.constant 0 : index
    %168 = vector.load %arg8[%c0_99, %c0_100] : memref<128x128xf32, #tpu.memory_space<vmem>>, vector<128x128xf32>
    %c0_101 = arith.constant 0 : index
    %c0_102 = arith.constant 0 : index
    %169 = vector.load %arg9[%c0_101, %c0_102] : memref<1x128xf32, #tpu.memory_space<vmem>>, vector<1x128xf32>
    %cst_103 = arith.constant dense<0.000000e+00> : vector<8x128xf32>
    %170 = tpu.matmul %167, %168, %cst_103 {dimension_numbers = #tpu.dot_dimension_numbers<[1], [0], [0], [1], [0, 0, 1, 1], [], []>} : vector<8x128xf32>, vector<128x128xf32>, vector<8x128xf32> -> vector<8x128xf32>
    %171 = vector.broadcast %169 : vector<1x128xf32> to vector<8x128xf32>
    %172 = arith.addf %170, %171 : vector<8x128xf32>
    %c0_104 = arith.constant 0 : index
    %c0_105 = arith.constant 0 : index
    %173 = vector.load %arg10[%c0_104, %c0_105] : memref<8x128xf32, #tpu.memory_space<vmem>>, vector<8x128xf32>
    tpu.vector_store %arg10[%c0_104, %c0_105], %172 {strides = array<i32>} : memref<8x128xf32, #tpu.memory_space<vmem>>, vector<8x128xf32>,
    return
  }
  func.func @transform_0(%arg0: i32) -> (i32, i32, i32) {
    %c0_i32 = arith.constant 0 : i32
    %c0_i32_0 = arith.constant 0 : i32
    %c0_i32_1 = arith.constant 0 : i32
    return %c0_i32, %arg0, %c0_i32_0 : i32, i32, i32
  }
  func.func @transform_1(%arg0: i32) -> (i32, i32) {
    %c0_i32 = arith.constant 0 : i32
    %c0_i32_0 = arith.constant 0 : i32
    %c0_i32_1 = arith.constant 0 : i32
    return %c0_i32, %c0_i32_0 : i32, i32
  }
  func.func @transform_2(%arg0: i32) -> (i32, i32) {
    %c0_i32 = arith.constant 0 : i32
    %c0_i32_0 = arith.constant 0 : i32
    %c0_i32_1 = arith.constant 0 : i32
    return %c0_i32, %c0_i32_0 : i32, i32
  }
  func.func @transform_3(%arg0: i32) -> (i32, i32) {
    %c0_i32 = arith.constant 0 : i32
    %c0_i32_0 = arith.constant 0 : i32
    %c0_i32_1 = arith.constant 0 : i32
    return %c0_i32, %c0_i32_0 : i32, i32
  }
  func.func @transform_4(%arg0: i32) -> (i32, i32) {
    %c0_i32 = arith.constant 0 : i32
    %c0_i32_0 = arith.constant 0 : i32
    %c0_i32_1 = arith.constant 0 : i32
    return %c0_i32, %c0_i32_0 : i32, i32
  }
  func.func @transform_5(%arg0: i32) -> (i32, i32) {
    %c0_i32 = arith.constant 0 : i32
    %c0_i32_0 = arith.constant 0 : i32
    %c0_i32_1 = arith.constant 0 : i32
    return %c0_i32, %c0_i32_0 : i32, i32
  }
  func.func @transform_6(%arg0: i32) -> (i32, i32) {
    %c0_i32 = arith.constant 0 : i32
    %c0_i32_0 = arith.constant 0 : i32
    %c0_i32_1 = arith.constant 0 : i32
    return %c0_i32, %c0_i32_0 : i32, i32
  }
  func.func @transform_7(%arg0: i32) -> (i32, i32) {
    %c0_i32 = arith.constant 0 : i32
    %c0_i32_0 = arith.constant 0 : i32
    %c0_i32_1 = arith.constant 0 : i32
    return %c0_i32, %c0_i32_0 : i32, i32
  }
  func.func @transform_8(%arg0: i32) -> (i32, i32) {
    %c0_i32 = arith.constant 0 : i32
    %c0_i32_0 = arith.constant 0 : i32
    %c0_i32_1 = arith.constant 0 : i32
    return %c0_i32, %c0_i32_0 : i32, i32
  }
  func.func @transform_9(%arg0: i32) -> (i32, i32) {
    %c0_i32 = arith.constant 0 : i32
    %c0_i32_0 = arith.constant 0 : i32
    return %arg0, %c0_i32 : i32, i32
  }
}

</mosaic_0001>

<bundles_post_ra>
// kernel: tpu_custom_call.1
= control target key start
LH: loop header
LB: loop body
LE: loop exit
PB: predicated region body
PF: predicated region fallthrough
CT: control target
= control target key end

     0   :  { %14 = vsyncpa [#allocation5], 0  ;;  %s2762_s0 = inlined_call_operand.hbm [shape: f32[8,8,128], index: 0, kind: input, shape index: {}]   ;;  %s2763_s1 = inlined_call_operand.hbm [shape: bf16[128,128], index: 1, kind: input, shape index: {}]   ;;  %s2764_s2 = inlined_call_operand.hbm [shape: bf16[128,128], index: 2, kind: input, shape index: {}]   ;;  %s2765_s3 = inlined_call_operand.vmem [shape: f32[1,128], index: 3, kind: input, shape index: {}]   ;;  %s2766_s4 = inlined_call_operand.hbm [shape: bf16[128,128], index: 4, kind: input, shape index: {}]   ;;  %s2767_s5 = inlined_call_operand.hbm [shape: bf16[128,128], index: 5, kind: input, shape index: {}]   ;;  %s2768_s6 = inlined_call_operand.vmem [shape: f32[1,128], index: 6, kind: input, shape index: {}]   ;;  %s2769_s7 = inlined_call_operand.hbm [shape: f32[128,128], index: 7, kind: input, shape index: {}]   ;;  %s2770_s8 = inlined_call_operand.vmem [shape: f32[1,128], index: 8, kind: input, shape index: {}]   ;;  %s2771_s9 = inlined_call_operand.hbm [shape: f32[8,128], index: 9, kind: output, shape index: {}]  }
   0x1   :  { %15 = vsyncpa [#allocation8], 0 }
   0x2   :  { %16 = vsyncpa [#allocation11], 0 }
   0x3   :  { %17 = vsyncpa [#allocation14], 0 }
   0x4   :  { %18 = vsyncpa [#allocation6], 0  ;;  %s2243_s30 = smov [#allocation7]  }
   0x5   :  { %s36_s10 = sshll.u32 %s2243_s30, 4  ;;  %s37_s10 = int_to_ptr.vmem [resolvable:$true] %s36_s10 }
   0x6   :  { %s2101_s11 = scalar_lea.vmem %s37_s10, 1024  ;;  %p2106_p1 = scmp.lt.s32.totalorder %s37_s10, %s37_s10 }
   0x7   :  { %p2102_p0 = scmp.ne.s32.totalorder %s37_s10, %s2101_s11  ;;  %p2107_p2 = scmp.lt.s32.totalorder %s2101_s11, %s2101_s11 }
   0x9   :  { %p2108_p3 = por %p2107_p2, %p2106_p1 }
   0xb   :  { %p2109_p4 = pnand %p2108_p3, %p2102_p0 }
   0xd   :  { %2112 = shalt.err (!%p2109_p4)
}
   0xe   :  { %s2244_s12 = smov 64   ;;  %s2245_s13 = smov 4  }
   0xf   :  { %42 = dma.hbm_to_vmem [thread:$0]  %s2763_s1, 1024, %s37_s10, [#allocation8], %s2244_s12, %s2244_s12, %s2245_s13  }
  0x10   :  { %s2246_s16 = smov [#allocation10]   ;;  %s2247_s18 = smov [#allocation4]  }
  0x11   :  { %s62_s17 = sshll.u32 %s2246_s16, 4  ;;  %s24_s19 = sshll.u32 %s2247_s18, 4  ;;  %s63_s17 = int_to_ptr.vmem [resolvable:$true] %s62_s17  ;;  %s25_s19 = int_to_ptr.vmem [resolvable:$true] %s24_s19 }
  0x12   :  { %s2121_s20 = scalar_lea.vmem %s63_s17, 1024  ;;  %p2126_p6 = scmp.lt.s32.totalorder %s63_s17, %s63_s17 }
  0x13   :  { %p2122_p5 = scmp.ne.s32.totalorder %s63_s17, %s2121_s20  ;;  %p2127_p7 = scmp.lt.s32.totalorder %s2121_s20, %s2121_s20 }
  0x15   :  { %p2128_p8 = por %p2127_p7, %p2126_p6 }
  0x17   :  { %p2129_p9 = pnand %p2128_p8, %p2122_p5 }
  0x19   :  { %2132 = shalt.err (!%p2129_p9)
}
  0x1a   :  { %68 = dma.hbm_to_vmem [thread:$0]  %s2766_s4, 1024, %s63_s17, [#allocation11], %s2244_s12, %s2244_s12, %s2245_s13  }
  0x1b   :  { %s2141_s1 = scalar_lea.vmem %s25_s19, 1024  ;;  %p2146_p11 = scmp.lt.s32.totalorder %s25_s19, %s25_s19 }
  0x1c   :  { %p2142_p10 = scmp.ne.s32.totalorder %s25_s19, %s2141_s1  ;;  %p2147_p12 = scmp.lt.s32.totalorder %s2141_s1, %s2141_s1 }
  0x1e   :  { %p2148_p13 = por %p2147_p12, %p2146_p11 }
  0x20   :  { %p2149_p0 = pnand %p2148_p13, %p2142_p10 }
  0x22   :  { %2152 = shalt.err (!%p2149_p0)
}
  0x23   :  { %s2248_s23 = smov 128   ;;  %s2249_s24 = smov 8  }
  0x24   :  { %30 = dma.hbm_to_vmem [thread:$0]  %s2762_s0, 1024, %s25_s19, [#allocation5], %s2248_s23, %s2248_s23, %s2249_s24  }
  0x25   :  { %s2250_s27 = smov [#allocation9]   ;;  %s2251_s4 = smov [#allocation12]  }
  0x26   :  { %s48_s28 = sshll.u32 %s2250_s27, 4  ;;  %s74_s29 = sshll.u32 %s2251_s4, 4  ;;  %s49_s28 = int_to_ptr.vmem [resolvable:$true] %s48_s28  ;;  %s75_s29 = int_to_ptr.vmem [resolvable:$true] %s74_s29 }
  0x27   :  { %s2161_s30 = scalar_lea.vmem %s49_s28, 1024  ;;  %p2166_p2 = scmp.lt.s32.totalorder %s49_s28, %s49_s28 }
  0x28   :  { %p2162_p1 = scmp.ne.s32.totalorder %s49_s28, %s2161_s30  ;;  %p2167_p3 = scmp.lt.s32.totalorder %s2161_s30, %s2161_s30 }
  0x2a   :  { %p2168_p4 = por %p2167_p3, %p2166_p2 }
  0x2c   :  { %p2169_p5 = pnand %p2168_p4, %p2162_p1 }
  0x2e   :  { %2172 = shalt.err (!%p2169_p5)
}
  0x2f   :  { %54 = dma.hbm_to_vmem [thread:$0]  %s2764_s2, 1024, %s49_s28, [#allocation8], %s2244_s12, %s2244_s12, %s2245_s13  }
  0x30   :  { %s2181_s0 = scalar_lea.vmem %s75_s29, 1024  ;;  %p2186_p7 = scmp.lt.s32.totalorder %s75_s29, %s75_s29 }
  0x31   :  { %p2182_p6 = scmp.ne.s32.totalorder %s75_s29, %s2181_s0  ;;  %p2187_p8 = scmp.lt.s32.totalorder %s2181_s0, %s2181_s0 }
  0x33   :  { %p2188_p9 = por %p2187_p8, %p2186_p7 }
  0x35   :  { %p2189_p10 = pnand %p2188_p9, %p2182_p6 }
  0x37   :  { %2192 = shalt.err (!%p2189_p10)
}
  0x38   :  { %80 = dma.hbm_to_vmem [thread:$0]  %s2767_s5, 1024, %s75_s29, [#allocation11], %s2244_s12, %s2244_s12, %s2245_s13  }
  0x39   :  { %s2252_s16 = smov [#allocation13]  }
  0x3a   :  { %s88_s17 = sshll.u32 %s2252_s16, 4  ;;  %s89_s17 = int_to_ptr.vmem [resolvable:$true] %s88_s17 }
  0x3b   :  { %s2201_s18 = scalar_lea.vmem %s89_s17, 2048  ;;  %p2206_p12 = scmp.lt.s32.totalorder %s89_s17, %s89_s17 }
  0x3c   :  { %p2202_p11 = scmp.ne.s32.totalorder %s89_s17, %s2201_s18  ;;  %p2207_p13 = scmp.lt.s32.totalorder %s2201_s18, %s2201_s18 }
  0x3e   :  { %p2208_p0 = por %p2207_p13, %p2206_p12 }
  0x40   :  { %p2209_p1 = pnand %p2208_p0, %p2202_p11 }
  0x42   :  { %2212 = shalt.err (!%p2209_p1)
}
  0x43   :  { %94 = dma.hbm_to_vmem [thread:$0]  %s2769_s7, 2048, %s89_s17, [#allocation14], %s2248_s23, %s2248_s23, %s2249_s24  }
  0x44   :  { %2233 = dma.done.wait [#allocation5], 1024  }
  0x45   :  { %2234 = vsyncadd [#allocation5], 4294966272 }
  0x46   :  { %2235 = dma.done.wait [#allocation8], 2048  }
  0x47   :  { %2236 = vsyncadd [#allocation8], 4294965248 }
  0x48   :  { %2237 = dma.done.wait [#allocation11], 2048  }
  0x49   :  { %2238 = vsyncadd [#allocation11], 4294965248 }
  0x4a   :  { %2239 = dma.done.wait [#allocation14], 2048  }
  0x4b   :  { %2240 = vsyncadd [#allocation14], 4294965248  ;;  %v2253_v0 = vmov 0.0   ;;  %vm2254_vm0 = vmmov 0   ;;  %v2029_v1 = vld [vmem:[#allocation7 + $0x38] sm:$0xff]   ;;  %v2031_v3 = vld [vmem:[#allocation7 + $0x30] sm:$0xff]  }
  0x4c   :  { %1636 = vmatprep.subr.bf16.mxu1 %v2253_v0  ;;  %1652 = vmatprep.mubr.msk.bf16.mxu1 %vm2254_vm0, %v2253_v0  ;;  %v2346_v2 = vld [vmem:[#allocation9 + $0x38] sm:$0xff]   ;;  %v2349_v4 = vld [vmem:[#allocation9 + $0x30] sm:$0xff]   ;;  %v2033_v5 = vld [vmem:[#allocation7 + $0x28] sm:$0xff]   ;;  %v2255_v23 = vmov 0   ;;  %s2256_s20 = smov [#allocation15]  }
  0x4d   :  { %1612 = vmatprep.subr.bf16.mxu0 %v2029_v1  ;;  %1637 = vmatpush3.bf16.msra.mxu1 %v2346_v2  ;;  %v2353_v6 = vld [vmem:[#allocation9 + $0x28] sm:$0xff]   ;;  %v2035_v7 = vld [vmem:[#allocation7 + $0x20] sm:$0xff]   ;;  %v2037_v9 = vld [vmem:[#allocation7 + $0x18] sm:$0xff]   ;;  %s1380_s21 = sshll.u32 %s2256_s20, 4  ;;  %s1381_s21 = int_to_ptr.vmem [resolvable:$true] %s1380_s21 }
  0x4e   :  { %1613 = vmatpush3.bf16.msra.mxu0 %v2029_v1  ;;  %1638 = vmatprep.subr.bf16.mxu1 %v2253_v0  ;;  %v2357_v8 = vld [vmem:[#allocation9 + $0x20] sm:$0xff]   ;;  %v2361_v10 = vld [vmem:[#allocation9 + $0x18] sm:$0xff]   ;;  %v2039_v11 = vld [vmem:[#allocation7 + $0x10] sm:$0xff]   ;;  %s2213_s22 = scalar_lea.vmem %s1381_s21, 128  ;;  %p2218_p3 = scmp.lt.s32.totalorder %s1381_s21, %s1381_s21 }
  0x4f   :  { %1614 = vmatprep.subr.bf16.mxu0 %v2031_v3  ;;  %v149_v12 = vld [vmem:[#allocation4] sm:$0xff]  ;;  %v150_v13 = vld [vmem:[#allocation4 + $0x8] sm:$0xff]  ;;  %v2364_v14 = vld [vmem:[#allocation9 + $0x10] sm:$0xff]   ;;  %p2214_p2 = scmp.ne.s32.totalorder %s1381_s21, %s2213_s22  ;;  %p2219_p4 = scmp.lt.s32.totalorder %s2213_s22, %s2213_s22 }
  0x50   :  { %v157_v15 = vpack.c.bf16 %v150_v13, %v149_v12  ;;  %v2041_v16 = vld [vmem:[#allocation7 + $0x8] sm:$0xff]   ;;  %v2043_v18 = vld [vmem:[#allocation7] sm:$0xff]   ;;  %v151_v20 = vld [vmem:[#allocation4 + $0x10] sm:$0xff] }
  0x51   :  { %1639 = vmatpush3.bf16.msra.mxu1 %v2349_v4  ;;  %v2368_v17 = vld [vmem:[#allocation9 + $0x8] sm:$0xff]   ;;  %v2372_v19 = vld [vmem:[#allocation9] sm:$0xff]   ;;  %v152_v21 = vld [vmem:[#allocation4 + $0x18] sm:$0xff]  ;;  %p2220_p5 = por %p2219_p4, %p2218_p3 }
  0x52   :  { %1615 = vmatpush3.bf16.msra.mxu0 %v2031_v3  ;;  %1640 = vmatprep.subr.bf16.mxu1 %v2253_v0  ;;  %v158_v22 = vpack.c.bf16 %v152_v21, %v151_v20  ;;  %v153_v24 = vld [vmem:[#allocation4 + $0x20] sm:$0xff]  ;;  %v154_v25 = vld [vmem:[#allocation4 + $0x28] sm:$0xff]  ;;  %v155_v27 = vld [vmem:[#allocation4 + $0x30] sm:$0xff] }
  0x53   :  { %1616 = vmatprep.subr.bf16.mxu0 %v2033_v5  ;;  %1628 = vmatprep.mubr.bf16.mxu0 %v157_v15  ;;  %v159_v26 = vpack.c.bf16 %v154_v25, %v153_v24  ;;  %v156_v28 = vld [vmem:[#allocation4 + $0x38] sm:$0xff]  ;;  %v2419_v32 = vld [vmem:[%s2765_s3] ss:$0 sm:$0xff]  ;;  %p2221_p6 = pnand %p2220_p5, %p2214_p2 }
  0x54   :  { %v160_v29 = vpack.c.bf16 %v156_v28, %v155_v27 }
  0x55   :  { %1641 = vmatpush3.bf16.msra.mxu1 %v2353_v6 }
  0x56   :  { %1617 = vmatpush3.bf16.msra.mxu0 %v2033_v5  ;;  %1642 = vmatprep.subr.bf16.mxu1 %v2253_v0 }
  0x57   :  { %1618 = vmatprep.subr.bf16.mxu0 %v2035_v7 }
  0x59   :  { %1643 = vmatpush3.bf16.msra.mxu1 %v2357_v8 }
  0x5a   :  { %1619 = vmatpush3.bf16.msra.mxu0 %v2035_v7  ;;  %1644 = vmatprep.subr.bf16.mxu1 %v2253_v0 }
  0x5b   :  { %1620 = vmatprep.subr.bf16.mxu0 %v2037_v9 }
  0x5d   :  { %1645 = vmatpush3.bf16.msra.mxu1 %v2361_v10 }
  0x5e   :  { %1621 = vmatpush3.bf16.msra.mxu0 %v2037_v9  ;;  %1646 = vmatprep.subr.bf16.mxu1 %v2253_v0 }
  0x5f   :  { %1622 = vmatprep.subr.bf16.mxu0 %v2039_v11 }
  0x61   :  { %1647 = vmatpush3.bf16.msra.mxu1 %v2364_v14 }
  0x62   :  { %1623 = vmatpush3.bf16.msra.mxu0 %v2039_v11  ;;  %1648 = vmatprep.subr.bf16.mxu1 %v2253_v0 }
  0x63   :  { %1624 = vmatprep.subr.bf16.mxu0 %v2041_v16 }
  0x65   :  { %1649 = vmatpush3.bf16.msra.mxu1 %v2368_v17 }
  0x66   :  { %1625 = vmatpush3.bf16.msra.mxu0 %v2041_v16  ;;  %1650 = vmatprep.subr.bf16.mxu1 %v2253_v0 }
  0x67   :  { %1626 = vmatprep.subr.bf16.mxu0 %v2043_v18 }
  0x69   :  { %1651 = vmatpush3.bf16.msra.mxu1 %v2372_v19 }
  0x6a   :  { %1627 = vmatpush3.bf16.msra.mxu0 %v2043_v18  ;;  %1676 = vmatprep.subr.bf16.mxu1 %v2253_v0 }
  0x6b   :  { %1656 = vmatprep.subr.bf16.mxu0 %v2253_v0 }
  0x6c   :  { %1653 = vmatmul.mubr.bf16.vlgmr.msra.gmra.mxu1 %v2255_v23 }
  0x6d   :  { %1629 = vmatmul.mubr.bf16.vlgmr.msra.gmra.mxu0 %v158_v22  ;;  %1677 = vmatpush3.bf16.msra.mxu1 %v2346_v2 }
  0x6e   :  { %1657 = vmatpush3.bf16.msra.mxu0 %v2346_v2  ;;  %1678 = vmatprep.subr.bf16.mxu1 %v2253_v0 }
  0x6f   :  { %1658 = vmatprep.subr.bf16.mxu0 %v2253_v0  ;;  %1692 = vmatprep.mubr.msk.bf16.mxu1 %vm2254_vm0, %v2253_v0 }
  0x70   :  { %1632 = vmatprep.mubr.bf16.mxu0 %v159_v26 }
  0x71   :  { %1679 = vmatpush3.bf16.msra.mxu1 %v2349_v4 }
  0x72   :  { %1659 = vmatpush3.bf16.msra.mxu0 %v2349_v4  ;;  %1680 = vmatprep.subr.bf16.mxu1 %v2253_v0 }
  0x73   :  { %1660 = vmatprep.subr.bf16.mxu0 %v2253_v0 }
  0x75   :  { %1681 = vmatpush3.bf16.msra.mxu1 %v2353_v6  ;;  %1633 = vmatmul.mubr.bf16.gmra.mxu0 %v160_v29  ;;  %v2048_v29 = vld [vmem:[#allocation10 + $0x20] sm:$0xff]  }
  0x76   :  { %1661 = vmatpush3.bf16.msra.mxu0 %v2353_v6  ;;  %1682 = vmatprep.subr.bf16.mxu1 %v2253_v0 }
  0x77   :  { %1662 = vmatprep.subr.bf16.mxu0 %v2253_v0  ;;  %1672 = vmatprep.mubr.msk.bf16.mxu0 %vm2254_vm0, %v2253_v0 }
  0x79   :  { %1683 = vmatpush3.bf16.msra.mxu1 %v2357_v8 }
  0x7a   :  { %1663 = vmatpush3.bf16.msra.mxu0 %v2357_v8  ;;  %1684 = vmatprep.subr.bf16.mxu1 %v2253_v0 }
  0x7b   :  { %1664 = vmatprep.subr.bf16.mxu0 %v2253_v0 }
  0x7d   :  { %1685 = vmatpush3.bf16.msra.mxu1 %v2361_v10 }
  0x7e   :  { %1665 = vmatpush3.bf16.msra.mxu0 %v2361_v10  ;;  %1686 = vmatprep.subr.bf16.mxu1 %v2253_v0 }
  0x7f   :  { %1666 = vmatprep.subr.bf16.mxu0 %v2253_v0 }
  0x81   :  { %1687 = vmatpush3.bf16.msra.mxu1 %v2364_v14 }
  0x82   :  { %1667 = vmatpush3.bf16.msra.mxu0 %v2364_v14  ;;  %1688 = vmatprep.subr.bf16.mxu1 %v2253_v0 }
  0x83   :  { %1668 = vmatprep.subr.bf16.mxu0 %v2253_v0 }
  0x85   :  { %1689 = vmatpush3.bf16.msra.mxu1 %v2368_v17 }
  0x86   :  { %1669 = vmatpush3.bf16.msra.mxu0 %v2368_v17  ;;  %1690 = vmatprep.subr.bf16.mxu1 %v2253_v0 }
  0x87   :  { %1670 = vmatprep.subr.bf16.mxu0 %v2253_v0 }
  0x89   :  { %1691 = vmatpush3.bf16.msra.mxu1 %v2372_v19 }
  0x8a   :  { %1671 = vmatpush3.bf16.msra.mxu0 %v2372_v19  ;;  %1716 = vmatprep.subr.bf16.mxu1 %v2253_v0 }
  0x8b   :  { %1696 = vmatprep.subr.bf16.mxu0 %v2253_v0 }
 0x12c   :  { %v371_v30 = vpop.f32.mrf.mxu1 }
 0x12d   :  { %v1630_v31 = vpop.f32.mrf.mxu0 }
 0x12e   :  { %v1654_v33 = vpop.f32.mrf.mxu1  ;;  %v258_v55 = vadd.f32 %v1630_v31, %v2419_v32  ;;  %v2050_v31 = vld [vmem:[#allocation10 + $0x10] sm:$0xff]  }
 0x12f   :  { %v249_v34 = vpop.f32.mrf.mxu0  ;;  %v2051_v33 = vld [vmem:[#allocation10 + $0x8] sm:$0xff]  }
 0x130   :  { %v250_v35 = vadd.f32 %v2419_v32, %v249_v34  ;;  %v374_v36 = vpop.f32.mrf.mxu1  ;;  %v2052_v34 = vld [vmem:[#allocation10] sm:$0xff]  }
 0x131   :  { %v1631_v41 = vpop.f32.mrf.mxu0 }
 0x132   :  { %v377_v37 = vadd.f32 %v371_v30, %v250_v35  ;;  %v1655_v38 = vpop.f32.mrf.mxu1  ;;  %v261_v63 = vadd.f32 %v1631_v41, %v2419_v32  ;;  %v2049_v30 = vld [vmem:[#allocation10 + $0x18] sm:$0xff]  }
 0x133   :  { %v252_v42 = vpop.f32.mrf.mxu0  ;;  %v2551_v38 = vld [vmem:[#allocation12 + $0x30] sm:$0xff]   ;;  %v2563_v41 = vld [vmem:[#allocation12 + $0x18] sm:$0xff]  }
 0x134   :  { %2061 = vtanh.f32 %v377_v37  ;;  %v253_v47 = vadd.f32 %v2419_v32, %v252_v42  ;;  %v2547_v37 = vld [vmem:[#allocation12 + $0x38] sm:$0xff]   ;;  %v2567_v42 = vld [vmem:[#allocation12 + $0x10] sm:$0xff]  }
 0x135   :  { %v2444_v43 = vpop.f32.mrf.mxu0 }
 0x137   :  { %v2446_v44 = vpop.f32.mrf.mxu0 }
 0x138   :  { %v266_v13 = vadd.f32 %v2419_v32, %v2446_v44  ;;  %v2571_v44 = vld [vmem:[#allocation12 + $0x8] sm:$0xff]  }
 0x139   :  { %v2448_v45 = vpop.f32.mrf.mxu0 }
 0x13b   :  { %v2450_v46 = vpop.f32.mrf.mxu0 }
 0x141   :  { %v2422_v39 = vpop.eup %2061 }
 0x142   :  { %v382_v40 = vpack.c.bf16 %v2422_v39, %v2422_v39 }
 0x144   :  { %1673 = vmatmul.mubr.bf16.vlgmr.msra.gmra.mxu0 %v382_v40  ;;  %v2559_v40 = vld [vmem:[#allocation12 + $0x20] sm:$0xff]  }
 0x145   :  { %1697 = vmatpush3.bf16.msra.mxu0 %v2346_v2  ;;  %1712 = vmatprep.mubr.msk.bf16.mxu0 %vm2254_vm0, %v2253_v0 }
 0x146   :  { %1698 = vmatprep.subr.bf16.mxu0 %v2253_v0 }
 0x149   :  { %1699 = vmatpush3.bf16.msra.mxu0 %v2349_v4 }
 0x14a   :  { %1700 = vmatprep.subr.bf16.mxu0 %v2253_v0 }
 0x14d   :  { %1701 = vmatpush3.bf16.msra.mxu0 %v2353_v6 }
 0x14e   :  { %1702 = vmatprep.subr.bf16.mxu0 %v2253_v0 }
 0x151   :  { %1703 = vmatpush3.bf16.msra.mxu0 %v2357_v8 }
 0x152   :  { %1704 = vmatprep.subr.bf16.mxu0 %v2253_v0 }
 0x155   :  { %1705 = vmatpush3.bf16.msra.mxu0 %v2361_v10 }
 0x156   :  { %1706 = vmatprep.subr.bf16.mxu0 %v2253_v0 }
 0x159   :  { %1707 = vmatpush3.bf16.msra.mxu0 %v2364_v14 }
 0x15a   :  { %1708 = vmatprep.subr.bf16.mxu0 %v2253_v0 }
 0x15d   :  { %1709 = vmatpush3.bf16.msra.mxu0 %v2368_v17 }
 0x15e   :  { %1710 = vmatprep.subr.bf16.mxu0 %v2253_v0 }
 0x161   :  { %1711 = vmatpush3.bf16.msra.mxu0 %v2372_v19 }
 0x162   :  { %1736 = vmatprep.subr.bf16.mxu0 %v2253_v0 }
 0x204   :  { %v417_v48 = vpop.f32.mrf.mxu0 }
 0x205   :  { %v423_v49 = vadd.f32 %v417_v48, %v253_v47  ;;  %v274_v47 = vadd.f32 %v2444_v43, %v2419_v32 }
 0x206   :  { %v1674_v50 = vpop.f32.mrf.mxu0 }
 0x207   :  { %2063 = vtanh.f32 %v423_v49 }
 0x208   :  { %v420_v51 = vpop.f32.mrf.mxu0 }
 0x20a   :  { %v1675_v52 = vpop.f32.mrf.mxu0 }
 0x214   :  { %v2453_v53 = vpop.eup %2063 }
 0x215   :  { %v429_v54 = vpack.c.bf16 %v2453_v53, %v2453_v53  ;;  %v750_v28 = vpack.c.bf16 %v2453_v53, %v2422_v39  ;;  %v2555_v39 = vld [vmem:[#allocation12 + $0x28] sm:$0xff]  }
 0x217   :  { %1693 = vmatmul.mubr.bf16.vlgmr.msra.gmra.mxu1 %v429_v54 }
 0x218   :  { %1717 = vmatpush3.bf16.msra.mxu1 %v2346_v2  ;;  %1732 = vmatprep.mubr.msk.bf16.mxu1 %vm2254_vm0, %v2253_v0 }
 0x219   :  { %1718 = vmatprep.subr.bf16.mxu1 %v2253_v0 }
 0x21c   :  { %1719 = vmatpush3.bf16.msra.mxu1 %v2349_v4 }
 0x21d   :  { %1720 = vmatprep.subr.bf16.mxu1 %v2253_v0 }
 0x220   :  { %1721 = vmatpush3.bf16.msra.mxu1 %v2353_v6 }
 0x221   :  { %1722 = vmatprep.subr.bf16.mxu1 %v2253_v0 }
 0x224   :  { %1723 = vmatpush3.bf16.msra.mxu1 %v2357_v8 }
 0x225   :  { %1724 = vmatprep.subr.bf16.mxu1 %v2253_v0 }
 0x228   :  { %1725 = vmatpush3.bf16.msra.mxu1 %v2361_v10 }
 0x229   :  { %1726 = vmatprep.subr.bf16.mxu1 %v2253_v0 }
 0x22c   :  { %1727 = vmatpush3.bf16.msra.mxu1 %v2364_v14 }
 0x22d   :  { %1728 = vmatprep.subr.bf16.mxu1 %v2253_v0 }
 0x230   :  { %1729 = vmatpush3.bf16.msra.mxu1 %v2368_v17 }
 0x231   :  { %1730 = vmatprep.subr.bf16.mxu1 %v2253_v0 }
 0x234   :  { %1731 = vmatpush3.bf16.msra.mxu1 %v2372_v19 }
 0x235   :  { %1756 = vmatprep.subr.bf16.mxu1 %v2253_v0 }
 0x2d7   :  { %v464_v56 = vpop.f32.mrf.mxu1 }
 0x2d8   :  { %v470_v57 = vadd.f32 %v464_v56, %v258_v55 }
 0x2d9   :  { %v1694_v58 = vpop.f32.mrf.mxu1 }
 0x2da   :  { %2065 = vtanh.f32 %v470_v57 }
 0x2db   :  { %v467_v59 = vpop.f32.mrf.mxu1 }
 0x2dd   :  { %v1695_v60 = vpop.f32.mrf.mxu1 }
 0x2e7   :  { %v2476_v61 = vpop.eup %2065 }
 0x2e8   :  { %v476_v62 = vpack.c.bf16 %v2476_v61, %v2476_v61 }
 0x2ea   :  { %1713 = vmatmul.mubr.bf16.vlgmr.msra.gmra.mxu0 %v476_v62 }
 0x2eb   :  { %1737 = vmatpush3.bf16.msra.mxu0 %v2346_v2  ;;  %1752 = vmatprep.mubr.msk.bf16.mxu0 %vm2254_vm0, %v2253_v0 }
 0x2ec   :  { %1738 = vmatprep.subr.bf16.mxu0 %v2253_v0 }
 0x2ef   :  { %1739 = vmatpush3.bf16.msra.mxu0 %v2349_v4 }
 0x2f0   :  { %1740 = vmatprep.subr.bf16.mxu0 %v2253_v0 }
 0x2f3   :  { %1741 = vmatpush3.bf16.msra.mxu0 %v2353_v6 }
 0x2f4   :  { %1742 = vmatprep.subr.bf16.mxu0 %v2253_v0 }
 0x2f7   :  { %1743 = vmatpush3.bf16.msra.mxu0 %v2357_v8 }
 0x2f8   :  { %1744 = vmatprep.subr.bf16.mxu0 %v2253_v0 }
 0x2fb   :  { %1745 = vmatpush3.bf16.msra.mxu0 %v2361_v10 }
 0x2fc   :  { %1746 = vmatprep.subr.bf16.mxu0 %v2253_v0 }
 0x2ff   :  { %1747 = vmatpush3.bf16.msra.mxu0 %v2364_v14 }
 0x300   :  { %1748 = vmatprep.subr.bf16.mxu0 %v2253_v0 }
 0x303   :  { %1749 = vmatpush3.bf16.msra.mxu0 %v2368_v17 }
 0x304   :  { %1750 = vmatprep.subr.bf16.mxu0 %v2253_v0 }
 0x307   :  { %1751 = vmatpush3.bf16.msra.mxu0 %v2372_v19 }
 0x308   :  { %1776 = vmatprep.subr.bf16.mxu0 %v2253_v0 }
 0x3aa   :  { %v511_v1 = vpop.f32.mrf.mxu0 }
 0x3ab   :  { %v517_v3 = vadd.f32 %v511_v1, %v261_v63  ;;  %v2627_v63 = vld [vmem:[%s2768_s6] ss:$0 sm:$0xff] }
 0x3ac   :  { %v1714_v5 = vpop.f32.mrf.mxu0 }
 0x3ad   :  { %2067 = vtanh.f32 %v517_v3 }
 0x3ae   :  { %v514_v7 = vpop.f32.mrf.mxu0 }
 0x3b0   :  { %v1715_v9 = vpop.f32.mrf.mxu0 }
 0x3ba   :  { %v2499_v11 = vpop.eup %2067 }
 0x3bb   :  { %v523_v12 = vpack.c.bf16 %v2499_v11, %v2499_v11  ;;  %v751_v35 = vpack.c.bf16 %v2499_v11, %v2476_v61 }
 0x3bd   :  { %1733 = vmatmul.mubr.bf16.vlgmr.msra.gmra.mxu1 %v523_v12 }
 0x3be   :  { %1757 = vmatpush3.bf16.msra.mxu1 %v2346_v2  ;;  %1772 = vmatprep.mubr.msk.bf16.mxu1 %vm2254_vm0, %v2253_v0 }
 0x3bf   :  { %1758 = vmatprep.subr.bf16.mxu1 %v2253_v0 }
 0x3c2   :  { %1759 = vmatpush3.bf16.msra.mxu1 %v2349_v4 }
 0x3c3   :  { %1760 = vmatprep.subr.bf16.mxu1 %v2253_v0 }
 0x3c6   :  { %1761 = vmatpush3.bf16.msra.mxu1 %v2353_v6 }
 0x3c7   :  { %1762 = vmatprep.subr.bf16.mxu1 %v2253_v0 }
 0x3ca   :  { %1763 = vmatpush3.bf16.msra.mxu1 %v2357_v8 }
 0x3cb   :  { %1764 = vmatprep.subr.bf16.mxu1 %v2253_v0 }
 0x3ce   :  { %1765 = vmatpush3.bf16.msra.mxu1 %v2361_v10 }
 0x3cf   :  { %1766 = vmatprep.subr.bf16.mxu1 %v2253_v0 }
 0x3d2   :  { %1767 = vmatpush3.bf16.msra.mxu1 %v2364_v14 }
 0x3d3   :  { %1768 = vmatprep.subr.bf16.mxu1 %v2253_v0 }
 0x3d6   :  { %1769 = vmatpush3.bf16.msra.mxu1 %v2368_v17 }
 0x3d7   :  { %1770 = vmatprep.subr.bf16.mxu1 %v2253_v0 }
 0x3da   :  { %1771 = vmatpush3.bf16.msra.mxu1 %v2372_v19 }
 0x47d   :  { %v558_v15 = vpop.f32.mrf.mxu1 }
 0x47e   :  { %v564_v16 = vadd.f32 %v558_v15, %v266_v13 }
 0x47f   :  { %v1734_v18 = vpop.f32.mrf.mxu1 }
 0x480   :  { %2069 = vtanh.f32 %v564_v16 }
 0x481   :  { %v561_v20 = vpop.f32.mrf.mxu1 }
 0x483   :  { %v1735_v21 = vpop.f32.mrf.mxu1 }
 0x48d   :  { %v2070_v22 = vpop.eup %2069 }
 0x48e   :  { %v570_v24 = vpack.c.bf16 %v2070_v22, %v2070_v22 }
 0x490   :  { %1753 = vmatmul.mubr.bf16.vlgmr.msra.gmra.mxu0 %v570_v24 }
 0x491   :  { %1777 = vmatpush3.bf16.msra.mxu0 %v2346_v2  ;;  %1792 = vmatprep.mubr.msk.bf16.mxu0 %vm2254_vm0, %v2253_v0  ;;  %v2045_v2 = vld [vmem:[#allocation10 + $0x38] sm:$0xff]  }
 0x492   :  { %1778 = vmatprep.subr.bf16.mxu0 %v2253_v0  ;;  %1796 = vmatprep.subr.bf16.mxu1 %v2045_v2 }
 0x495   :  { %1779 = vmatpush3.bf16.msra.mxu0 %v2349_v4  ;;  %v269_v4 = vadd.f32 %v2419_v32, %v2450_v46  ;;  %v2575_v46 = vld [vmem:[#allocation12] sm:$0xff]  }
 0x496   :  { %1780 = vmatprep.subr.bf16.mxu0 %v2253_v0 }
 0x499   :  { %1781 = vmatpush3.bf16.msra.mxu0 %v2353_v6 }
 0x49a   :  { %1782 = vmatprep.subr.bf16.mxu0 %v2253_v0 }
 0x49d   :  { %1783 = vmatpush3.bf16.msra.mxu0 %v2357_v8 }
 0x49e   :  { %1784 = vmatprep.subr.bf16.mxu0 %v2253_v0 }
 0x4a1   :  { %1785 = vmatpush3.bf16.msra.mxu0 %v2361_v10 }
 0x4a2   :  { %1786 = vmatprep.subr.bf16.mxu0 %v2253_v0 }
 0x4a5   :  { %1787 = vmatpush3.bf16.msra.mxu0 %v2364_v14 }
 0x4a6   :  { %1788 = vmatprep.subr.bf16.mxu0 %v2253_v0 }
 0x4a9   :  { %1789 = vmatpush3.bf16.msra.mxu0 %v2368_v17  ;;  %v2046_v17 = vld [vmem:[#allocation10 + $0x30] sm:$0xff]  }
 0x4aa   :  { %1790 = vmatprep.subr.bf16.mxu0 %v2253_v0 }
 0x4ad   :  { %1791 = vmatpush3.bf16.msra.mxu0 %v2372_v19  ;;  %v2047_v19 = vld [vmem:[#allocation10 + $0x28] sm:$0xff]  }
 0x4ae   :  { %1820 = vmatprep.subr.bf16.mxu0 %v2253_v0 }
 0x550   :  { %v605_v6 = vpop.f32.mrf.mxu0 }
 0x551   :  { %v611_v8 = vadd.f32 %v605_v6, %v269_v4 }
 0x552   :  { %v1754_v10 = vpop.f32.mrf.mxu0 }
 0x553   :  { %2071 = vtanh.f32 %v611_v8 }
 0x554   :  { %v608_v14 = vpop.f32.mrf.mxu0 }
 0x556   :  { %v1755_v25 = vpop.f32.mrf.mxu0 }
 0x560   :  { %v2072_v26 = vpop.eup %2071 }
 0x561   :  { %v617_v27 = vpack.c.bf16 %v2072_v26, %v2072_v26  ;;  %v752_v36 = vpack.c.bf16 %v2072_v26, %v2070_v22 }
 0x563   :  { %1773 = vmatmul.mubr.bf16.vlgmr.msra.gmra.mxu1 %v617_v27 }
 0x564   :  { %1797 = vmatpush3.bf16.msra.mxu1 %v2045_v2  ;;  %1812 = vmatprep.mubr.bf16.mxu1 %v750_v28 }
 0x565   :  { %1798 = vmatprep.subr.bf16.mxu1 %v2046_v17 }
 0x568   :  { %1799 = vmatpush3.bf16.msra.mxu1 %v2046_v17 }
 0x569   :  { %1800 = vmatprep.subr.bf16.mxu1 %v2047_v19 }
 0x56c   :  { %1801 = vmatpush3.bf16.msra.mxu1 %v2047_v19 }
 0x56d   :  { %1802 = vmatprep.subr.bf16.mxu1 %v2048_v29 }
 0x570   :  { %1803 = vmatpush3.bf16.msra.mxu1 %v2048_v29 }
 0x571   :  { %1804 = vmatprep.subr.bf16.mxu1 %v2049_v30 }
 0x574   :  { %1805 = vmatpush3.bf16.msra.mxu1 %v2049_v30 }
 0x575   :  { %1806 = vmatprep.subr.bf16.mxu1 %v2050_v31 }
 0x578   :  { %1807 = vmatpush3.bf16.msra.mxu1 %v2050_v31 }
 0x579   :  { %1808 = vmatprep.subr.bf16.mxu1 %v2051_v33 }
 0x57c   :  { %1809 = vmatpush3.bf16.msra.mxu1 %v2051_v33 }
 0x57d   :  { %1810 = vmatprep.subr.bf16.mxu1 %v2052_v34 }
 0x580   :  { %1811 = vmatpush3.bf16.msra.mxu1 %v2052_v34 }
 0x581   :  { %1840 = vmatprep.subr.bf16.mxu1 %v2253_v0 }
 0x583   :  { %1813 = vmatmul.mubr.bf16.vlgmr.msra.gmra.mxu1 %v751_v35 }
 0x584   :  { %1816 = vmatprep.mubr.bf16.mxu1 %v752_v36  ;;  %1841 = vmatpush3.bf16.msra.mxu1 %v2547_v37 }
 0x585   :  { %1842 = vmatprep.subr.bf16.mxu1 %v2253_v0 }
 0x588   :  { %1843 = vmatpush3.bf16.msra.mxu1 %v2551_v38 }
 0x589   :  { %1844 = vmatprep.subr.bf16.mxu1 %v2253_v0 }
 0x58c   :  { %1845 = vmatpush3.bf16.msra.mxu1 %v2555_v39 }
 0x58d   :  { %1846 = vmatprep.subr.bf16.mxu1 %v2253_v0 }
 0x590   :  { %1847 = vmatpush3.bf16.msra.mxu1 %v2559_v40 }
 0x591   :  { %1848 = vmatprep.subr.bf16.mxu1 %v2253_v0 }
 0x594   :  { %1849 = vmatpush3.bf16.msra.mxu1 %v2563_v41 }
 0x595   :  { %1850 = vmatprep.subr.bf16.mxu1 %v2253_v0 }
 0x598   :  { %1851 = vmatpush3.bf16.msra.mxu1 %v2567_v42 }
 0x599   :  { %1852 = vmatprep.subr.bf16.mxu1 %v2253_v0 }
 0x59c   :  { %1853 = vmatpush3.bf16.msra.mxu1 %v2571_v44 }
 0x59d   :  { %1854 = vmatprep.subr.bf16.mxu1 %v2253_v0 }
 0x5a0   :  { %1855 = vmatpush3.bf16.msra.mxu1 %v2575_v46 }
 0x5a1   :  { %1880 = vmatprep.subr.bf16.mxu1 %v2253_v0 }
 0x623   :  { %v652_v48 = vpop.f32.mrf.mxu1 }
 0x624   :  { %v658_v49 = vadd.f32 %v652_v48, %v274_v47 }
 0x625   :  { %v1774_v50 = vpop.f32.mrf.mxu1 }
 0x626   :  { %2073 = vtanh.f32 %v658_v49 }
 0x627   :  { %v655_v51 = vpop.f32.mrf.mxu1 }
 0x629   :  { %v1775_v52 = vpop.f32.mrf.mxu1 }
 0x633   :  { %v2074_v53 = vpop.eup %2073 }
 0x634   :  { %v664_v54 = vpack.c.bf16 %v2074_v53, %v2074_v53 }
 0x636   :  { %1793 = vmatmul.mubr.bf16.vlgmr.msra.gmra.mxu0 %v664_v54 }
 0x637   :  { %1821 = vmatpush3.bf16.msra.mxu0 %v2547_v37  ;;  %1836 = vmatprep.mubr.msk.bf16.mxu0 %vm2254_vm0, %v2253_v0 }
 0x638   :  { %1822 = vmatprep.subr.bf16.mxu0 %v2253_v0 }
 0x63b   :  { %1823 = vmatpush3.bf16.msra.mxu0 %v2551_v38 }
 0x63c   :  { %1824 = vmatprep.subr.bf16.mxu0 %v2253_v0 }
 0x63f   :  { %1825 = vmatpush3.bf16.msra.mxu0 %v2555_v39 }
 0x640   :  { %1826 = vmatprep.subr.bf16.mxu0 %v2253_v0 }
 0x643   :  { %1827 = vmatpush3.bf16.msra.mxu0 %v2559_v40  ;;  %v2622_v61 = vpop.f32.mrf.mxu1 }
 0x644   :  { %1828 = vmatprep.subr.bf16.mxu0 %v2253_v0  ;;  %v851_v14 = vadd.f32 %v2622_v61, %v2627_v63  ;;  %v1289_v61 = vld [vmem:[#allocation13 + $0x48] sm:$0xff] }
 0x645   :  { %v842_v62 = vpop.f32.mrf.mxu1 }
 0x647   :  { %1829 = vmatpush3.bf16.msra.mxu0 %v2563_v41  ;;  %v1815_v12 = vpop.f32.mrf.mxu1 }
 0x648   :  { %1830 = vmatprep.subr.bf16.mxu0 %v2253_v0  ;;  %v854_v30 = vadd.f32 %v1815_v12, %v2627_v63  ;;  %v1287_v12 = vld [vmem:[#allocation13 + $0x38] sm:$0xff] }
 0x649   :  { %v845_v13 = vpop.f32.mrf.mxu1 }
 0x64a   :  { %v846_v21 = vadd.f32 %v2627_v63, %v845_v13  ;;  %v1286_v13 = vld [vmem:[#allocation13 + $0x30] sm:$0xff] }
 0x64b   :  { %1831 = vmatpush3.bf16.msra.mxu0 %v2567_v42 }
 0x64c   :  { %1832 = vmatprep.subr.bf16.mxu0 %v2253_v0 }
 0x64f   :  { %1833 = vmatpush3.bf16.msra.mxu0 %v2571_v44 }
 0x650   :  { %1834 = vmatprep.subr.bf16.mxu0 %v2253_v0 }
 0x653   :  { %1835 = vmatpush3.bf16.msra.mxu0 %v2575_v46 }
 0x654   :  { %1860 = vmatprep.subr.bf16.mxu0 %v2253_v0 }
 0x656   :  { %1837 = vmatmul.mubr.bf16.vlgmr.msra.gmra.mxu0 %v2255_v23  ;;  %v277_v23 = vadd.f32 %v2448_v45, %v2419_v32  ;;  %v843_v32 = vadd.f32 %v2627_v63, %v842_v62 }
 0x657   :  { %1861 = vmatpush3.bf16.msra.mxu0 %v2547_v37  ;;  %1876 = vmatprep.mubr.msk.bf16.mxu0 %vm2254_vm0, %v2253_v0 }
 0x658   :  { %1862 = vmatprep.subr.bf16.mxu0 %v2253_v0 }
 0x65b   :  { %1863 = vmatpush3.bf16.msra.mxu0 %v2551_v38 }
 0x65c   :  { %1864 = vmatprep.subr.bf16.mxu0 %v2253_v0 }
 0x65f   :  { %1865 = vmatpush3.bf16.msra.mxu0 %v2555_v39 }
 0x660   :  { %1866 = vmatprep.subr.bf16.mxu0 %v2253_v0 }
 0x663   :  { %1867 = vmatpush3.bf16.msra.mxu0 %v2559_v40 }
 0x664   :  { %1868 = vmatprep.subr.bf16.mxu0 %v2253_v0 }
 0x667   :  { %1869 = vmatpush3.bf16.msra.mxu0 %v2563_v41 }
 0x668   :  { %1870 = vmatprep.subr.bf16.mxu0 %v2253_v0 }
 0x66b   :  { %1871 = vmatpush3.bf16.msra.mxu0 %v2567_v42 }
 0x66c   :  { %1872 = vmatprep.subr.bf16.mxu0 %v2253_v0 }
 0x66f   :  { %1873 = vmatpush3.bf16.msra.mxu0 %v2571_v44 }
 0x670   :  { %1874 = vmatprep.subr.bf16.mxu0 %v2253_v0 }
 0x673   :  { %1875 = vmatpush3.bf16.msra.mxu0 %v2575_v46 }
 0x674   :  { %1900 = vmatprep.subr.bf16.mxu0 %v2253_v0 }
 0x6f6   :  { %v699_v43 = vpop.f32.mrf.mxu0 }
 0x6f7   :  { %v705_v55 = vadd.f32 %v699_v43, %v277_v23 }
 0x6f8   :  { %v1794_v56 = vpop.f32.mrf.mxu0 }
 0x6f9   :  { %2075 = vtanh.f32 %v705_v55 }
 0x6fa   :  { %v702_v57 = vpop.f32.mrf.mxu0 }
 0x6fc   :  { %v1795_v58 = vpop.f32.mrf.mxu0 }
 0x6fd   :  { %v1292_v58 = vld [vmem:[#allocation13 + $0x60] sm:$0xff] }
 0x706   :  { %v2076_v59 = vpop.eup %2075 }
 0x707   :  { %v753_v60 = vpack.c.bf16 %v2076_v59, %v2074_v53  ;;  %v1291_v59 = vld [vmem:[#allocation13 + $0x58] sm:$0xff] }
 0x709   :  { %1817 = vmatmul.mubr.bf16.gmra.mxu1 %v753_v60  ;;  %v1290_v60 = vld [vmem:[#allocation13 + $0x50] sm:$0xff] }
 0x70a   :  { %1856 = vmatprep.mubr.msk.bf16.mxu1 %vm2254_vm0, %v2253_v0 }
 0x716   :  { %v964_v45 = vpop.f32.mrf.mxu0 }
 0x717   :  { %v970_v1 = vadd.f32 %v964_v45, %v843_v32 }
 0x718   :  { %v1838_v3 = vpop.f32.mrf.mxu0 }
 0x719   :  { %2077 = vtanh.f32 %v970_v1 }
 0x71a   :  { %v967_v5 = vpop.f32.mrf.mxu0 }
 0x71c   :  { %v1839_v7 = vpop.f32.mrf.mxu0 }
 0x726   :  { %v2078_v9 = vpop.eup %2077 }
 0x727   :  { %v973_v11 = vpack.c.bf16 %v2078_v9, %v2078_v9 }
 0x729   :  { %1857 = vmatmul.mubr.bf16.vlgmr.msra.gmra.mxu1 %v973_v11  ;;  %v1288_v11 = vld [vmem:[#allocation13 + $0x40] sm:$0xff] }
 0x72a   :  { %1881 = vmatpush3.bf16.msra.mxu1 %v2547_v37  ;;  %1896 = vmatprep.mubr.msk.bf16.mxu1 %vm2254_vm0, %v2253_v0 }
 0x72b   :  { %1882 = vmatprep.subr.bf16.mxu1 %v2253_v0 }
 0x72e   :  { %1883 = vmatpush3.bf16.msra.mxu1 %v2551_v38 }
 0x72f   :  { %1884 = vmatprep.subr.bf16.mxu1 %v2253_v0 }
 0x732   :  { %1885 = vmatpush3.bf16.msra.mxu1 %v2555_v39 }
 0x733   :  { %1886 = vmatprep.subr.bf16.mxu1 %v2253_v0 }
 0x736   :  { %1887 = vmatpush3.bf16.msra.mxu1 %v2559_v40 }
 0x737   :  { %1888 = vmatprep.subr.bf16.mxu1 %v2253_v0 }
 0x73a   :  { %1889 = vmatpush3.bf16.msra.mxu1 %v2563_v41 }
 0x73b   :  { %1890 = vmatprep.subr.bf16.mxu1 %v2253_v0 }
 0x73e   :  { %1891 = vmatpush3.bf16.msra.mxu1 %v2567_v42 }
 0x73f   :  { %1892 = vmatprep.subr.bf16.mxu1 %v2253_v0 }
 0x742   :  { %1893 = vmatpush3.bf16.msra.mxu1 %v2571_v44 }
 0x743   :  { %1894 = vmatprep.subr.bf16.mxu1 %v2253_v0 }
 0x746   :  { %1895 = vmatpush3.bf16.msra.mxu1 %v2575_v46 }
 0x747   :  { %1920 = vmatprep.subr.bf16.mxu1 %v2253_v0 }
 0x7c9   :  { %v2648_v15 = vpop.f32.mrf.mxu1 }
 0x7ca   :  { %v867_v62 = vadd.f32 %v2648_v15, %v2627_v63  ;;  %v1285_v15 = vld [vmem:[#allocation13 + $0x28] sm:$0xff] }
 0x7cb   :  { %v2650_v16 = vpop.f32.mrf.mxu1 }
 0x7cc   :  { %v859_v49 = vadd.f32 %v2627_v63, %v2650_v16  ;;  %v1284_v16 = vld [vmem:[#allocation13 + $0x20] sm:$0xff] }
 0x7cd   :  { %v2652_v18 = vpop.f32.mrf.mxu1 }
 0x7cf   :  { %v2654_v20 = vpop.f32.mrf.mxu1 }
 0x7e9   :  { %v1008_v22 = vpop.f32.mrf.mxu1 }
 0x7ea   :  { %v1014_v24 = vadd.f32 %v1008_v22, %v846_v21  ;;  %v1282_v21 = vld [vmem:[#allocation13 + $0x10] sm:$0xff]  ;;  %v1281_v22 = vld [vmem:[#allocation13 + $0x8] sm:$0xff] }
 0x7eb   :  { %v1858_v2 = vpop.f32.mrf.mxu1 }
 0x7ec   :  { %2079 = vtanh.f32 %v1014_v24  ;;  %v1280_v24 = vld [vmem:[#allocation13] sm:$0xff]  ;;  %v870_v2 = vadd.f32 %v2652_v18, %v2627_v63 }
 0x7ed   :  { %v1011_v4 = vpop.f32.mrf.mxu1 }
 0x7ef   :  { %v1859_v6 = vpop.f32.mrf.mxu1 }
 0x7f9   :  { %v2080_v8 = vpop.eup %2079 }
 0x7fa   :  { %v1017_v10 = vpack.c.bf16 %v2080_v8, %v2080_v8 }
 0x7fc   :  { %1877 = vmatmul.mubr.bf16.vlgmr.msra.gmra.mxu0 %v1017_v10 }
 0x7fd   :  { %1901 = vmatpush3.bf16.msra.mxu0 %v2547_v37  ;;  %1916 = vmatprep.mubr.msk.bf16.mxu0 %vm2254_vm0, %v2253_v0 }
 0x7fe   :  { %1902 = vmatprep.subr.bf16.mxu0 %v2253_v0 }
 0x801   :  { %1903 = vmatpush3.bf16.msra.mxu0 %v2551_v38 }
 0x802   :  { %1904 = vmatprep.subr.bf16.mxu0 %v2253_v0 }
 0x805   :  { %1905 = vmatpush3.bf16.msra.mxu0 %v2555_v39 }
 0x806   :  { %1906 = vmatprep.subr.bf16.mxu0 %v2253_v0 }
 0x809   :  { %1907 = vmatpush3.bf16.msra.mxu0 %v2559_v40 }
 0x80a   :  { %1908 = vmatprep.subr.bf16.mxu0 %v2253_v0 }
 0x80d   :  { %1909 = vmatpush3.bf16.msra.mxu0 %v2563_v41 }
 0x80e   :  { %1910 = vmatprep.subr.bf16.mxu0 %v2253_v0 }
 0x811   :  { %1911 = vmatpush3.bf16.msra.mxu0 %v2567_v42 }
 0x812   :  { %1912 = vmatprep.subr.bf16.mxu0 %v2253_v0 }
 0x815   :  { %1913 = vmatpush3.bf16.msra.mxu0 %v2571_v44 }
 0x816   :  { %1914 = vmatprep.subr.bf16.mxu0 %v2253_v0 }
 0x819   :  { %1915 = vmatpush3.bf16.msra.mxu0 %v2575_v46 }
 0x81a   :  { %1940 = vmatprep.subr.bf16.mxu0 %v2253_v0 }
 0x8bc   :  { %v1052_v25 = vpop.f32.mrf.mxu0 }
 0x8bd   :  { %v1058_v26 = vadd.f32 %v1052_v25, %v851_v14 }
 0x8be   :  { %v1878_v27 = vpop.f32.mrf.mxu0 }
 0x8bf   :  { %2081 = vtanh.f32 %v1058_v26  ;;  %v1426_v26 = vld [vmem:[%s2770_s8] ss:$0 sm:$0xff] }
 0x8c0   :  { %v1055_v17 = vpop.f32.mrf.mxu0 }
 0x8c2   :  { %v1879_v28 = vpop.f32.mrf.mxu0 }
 0x8cc   :  { %v2082_v19 = vpop.eup %2081 }
 0x8cd   :  { %v1061_v29 = vpack.c.bf16 %v2082_v19, %v2082_v19 }
 0x8cf   :  { %1897 = vmatmul.mubr.bf16.vlgmr.msra.gmra.mxu1 %v1061_v29 }
 0x8d0   :  { %1921 = vmatpush3.bf16.msra.mxu1 %v2547_v37  ;;  %1936 = vmatprep.mubr.msk.bf16.mxu1 %vm2254_vm0, %v2253_v0 }
 0x8d1   :  { %1922 = vmatprep.subr.bf16.mxu1 %v2253_v0 }
 0x8d4   :  { %1923 = vmatpush3.bf16.msra.mxu1 %v2551_v38 }
 0x8d5   :  { %1924 = vmatprep.subr.bf16.mxu1 %v2253_v0 }
 0x8d8   :  { %1925 = vmatpush3.bf16.msra.mxu1 %v2555_v39 }
 0x8d9   :  { %1926 = vmatprep.subr.bf16.mxu1 %v2253_v0 }
 0x8dc   :  { %1927 = vmatpush3.bf16.msra.mxu1 %v2559_v40 }
 0x8dd   :  { %1928 = vmatprep.subr.bf16.mxu1 %v2253_v0 }
 0x8e0   :  { %1929 = vmatpush3.bf16.msra.mxu1 %v2563_v41 }
 0x8e1   :  { %1930 = vmatprep.subr.bf16.mxu1 %v2253_v0 }
 0x8e4   :  { %1931 = vmatpush3.bf16.msra.mxu1 %v2567_v42 }
 0x8e5   :  { %1932 = vmatprep.subr.bf16.mxu1 %v2253_v0 }
 0x8e8   :  { %1933 = vmatpush3.bf16.msra.mxu1 %v2571_v44 }
 0x8e9   :  { %1934 = vmatprep.subr.bf16.mxu1 %v2253_v0 }
 0x8ec   :  { %1935 = vmatpush3.bf16.msra.mxu1 %v2575_v46 }
 0x8ed   :  { %1960 = vmatprep.subr.bf16.mxu1 %v2253_v0 }
 0x98f   :  { %v1096_v31 = vpop.f32.mrf.mxu1 }
 0x990   :  { %v1102_v33 = vadd.f32 %v1096_v31, %v854_v30 }
 0x991   :  { %v1898_v34 = vpop.f32.mrf.mxu1 }
 0x992   :  { %2083 = vtanh.f32 %v1102_v33 }
 0x993   :  { %v1099_v35 = vpop.f32.mrf.mxu1 }
 0x995   :  { %v1899_v36 = vpop.f32.mrf.mxu1 }
 0x99f   :  { %v2084_v47 = vpop.eup %2083 }
 0x9a0   :  { %v1105_v48 = vpack.c.bf16 %v2084_v47, %v2084_v47 }
 0x9a2   :  { %1917 = vmatmul.mubr.bf16.vlgmr.msra.gmra.mxu0 %v1105_v48 }
 0x9a3   :  { %1941 = vmatpush3.bf16.msra.mxu0 %v2547_v37  ;;  %1956 = vmatprep.mubr.msk.bf16.mxu0 %vm2254_vm0, %v2253_v0 }
 0x9a4   :  { %1942 = vmatprep.subr.bf16.mxu0 %v2253_v0 }
 0x9a7   :  { %1943 = vmatpush3.bf16.msra.mxu0 %v2551_v38 }
 0x9a8   :  { %1944 = vmatprep.subr.bf16.mxu0 %v2253_v0 }
 0x9ab   :  { %1945 = vmatpush3.bf16.msra.mxu0 %v2555_v39 }
 0x9ac   :  { %1946 = vmatprep.subr.bf16.mxu0 %v2253_v0 }
 0x9af   :  { %1947 = vmatpush3.bf16.msra.mxu0 %v2559_v40 }
 0x9b0   :  { %1948 = vmatprep.subr.bf16.mxu0 %v2253_v0 }
 0x9b3   :  { %1949 = vmatpush3.bf16.msra.mxu0 %v2563_v41 }
 0x9b4   :  { %1950 = vmatprep.subr.bf16.mxu0 %v2253_v0 }
 0x9b7   :  { %1951 = vmatpush3.bf16.msra.mxu0 %v2567_v42 }
 0x9b8   :  { %1952 = vmatprep.subr.bf16.mxu0 %v2253_v0 }
 0x9bb   :  { %1953 = vmatpush3.bf16.msra.mxu0 %v2571_v44 }
 0x9bc   :  { %1954 = vmatprep.subr.bf16.mxu0 %v2253_v0 }
 0x9bf   :  { %1955 = vmatpush3.bf16.msra.mxu0 %v2575_v46 }
 0x9c0   :  { %1980 = vmatprep.subr.mxu0 %v2253_v0 }
 0xa62   :  { %v1140_v50 = vpop.f32.mrf.mxu0 }
 0xa63   :  { %v1146_v51 = vadd.f32 %v1140_v50, %v859_v49 }
 0xa64   :  { %v1918_v52 = vpop.f32.mrf.mxu0 }
 0xa65   :  { %2085 = vtanh.f32 %v1146_v51 }
 0xa66   :  { %v1143_v53 = vpop.f32.mrf.mxu0 }
 0xa68   :  { %v1919_v54 = vpop.f32.mrf.mxu0 }
 0xa72   :  { %v2086_v23 = vpop.eup %2085 }
 0xa73   :  { %v1149_v43 = vpack.c.bf16 %v2086_v23, %v2086_v23 }
 0xa75   :  { %1937 = vmatmul.mubr.bf16.vlgmr.msra.gmra.mxu1 %v1149_v43 }
 0xa76   :  { %1961 = vmatpush3.bf16.msra.mxu1 %v2547_v37  ;;  %1976 = vmatprep.mubr.msk.bf16.mxu1 %vm2254_vm0, %v2253_v0  ;;  %v862_v37 = vadd.f32 %v2627_v63, %v2654_v20  ;;  %v1283_v20 = vld [vmem:[#allocation13 + $0x18] sm:$0xff] }
 0xa77   :  { %1962 = vmatprep.subr.bf16.mxu1 %v2253_v0 }
 0xa7a   :  { %1963 = vmatpush3.bf16.msra.mxu1 %v2551_v38 }
 0xa7b   :  { %1964 = vmatprep.subr.bf16.mxu1 %v2253_v0 }
 0xa7e   :  { %1965 = vmatpush3.bf16.msra.mxu1 %v2555_v39 }
 0xa7f   :  { %1966 = vmatprep.subr.bf16.mxu1 %v2253_v0 }
 0xa82   :  { %1967 = vmatpush3.bf16.msra.mxu1 %v2559_v40 }
 0xa83   :  { %1968 = vmatprep.subr.bf16.mxu1 %v2253_v0 }
 0xa86   :  { %1969 = vmatpush3.bf16.msra.mxu1 %v2563_v41 }
 0xa87   :  { %1970 = vmatprep.subr.bf16.mxu1 %v2253_v0 }
 0xa8a   :  { %1971 = vmatpush3.bf16.msra.mxu1 %v2567_v42  ;;  %v1295_v42 = vld [vmem:[#allocation13 + $0x78] sm:$0xff] }
 0xa8b   :  { %1972 = vmatprep.subr.bf16.mxu1 %v2253_v0 }
 0xa8e   :  { %1973 = vmatpush3.bf16.msra.mxu1 %v2571_v44  ;;  %v1294_v44 = vld [vmem:[#allocation13 + $0x70] sm:$0xff] }
 0xa8f   :  { %1974 = vmatprep.subr.bf16.mxu1 %v2253_v0 }
 0xa92   :  { %1975 = vmatpush3.bf16.msra.mxu1 %v2575_v46  ;;  %v1293_v46 = vld [vmem:[#allocation13 + $0x68] sm:$0xff] }
 0xb35   :  { %v1184_v38 = vpop.f32.mrf.mxu1 }
 0xb36   :  { %v1190_v39 = vadd.f32 %v1184_v38, %v862_v37 }
 0xb37   :  { %v1938_v40 = vpop.f32.mrf.mxu1 }
 0xb38   :  { %2087 = vtanh.f32 %v1190_v39 }
 0xb39   :  { %v1187_v41 = vpop.f32.mrf.mxu1 }
 0xb3b   :  { %v1939_v55 = vpop.f32.mrf.mxu1 }
 0xb45   :  { %v2088_v56 = vpop.eup %2087 }
 0xb46   :  { %v1193_v57 = vpack.c.bf16 %v2088_v56, %v2088_v56 }
 0xb48   :  { %1957 = vmatmul.mubr.bf16.vlgmr.msra.gmra.mxu0 %v1193_v57 }
 0xb49   :  { %2012 = vmatprep.mubr.msk.f32.mxu0 %vm2254_vm0, %v2253_v0  ;;  %1981 = vmatpush3.msra.mxu0 %v1295_v42 }
 0xb4a   :  { %1982 = vmatprep.subr.mxu0 %v2253_v0 }
 0xb4b   :  { %1983 = vmatpush3.msra.mxu0 %v1294_v44 }
 0xb4c   :  { %1984 = vmatprep.subr.mxu0 %v2253_v0 }
 0xb4d   :  { %1985 = vmatpush3.msra.mxu0 %v1293_v46 }
 0xb4e   :  { %1986 = vmatprep.subr.mxu0 %v2253_v0 }
 0xb4f   :  { %1987 = vmatpush3.msra.mxu0 %v1292_v58 }
 0xb50   :  { %1988 = vmatprep.subr.mxu0 %v2253_v0 }
 0xb51   :  { %1989 = vmatpush3.msra.mxu0 %v1291_v59 }
 0xb52   :  { %1990 = vmatprep.subr.mxu0 %v2253_v0 }
 0xb53   :  { %1991 = vmatpush3.msra.mxu0 %v1290_v60 }
 0xb54   :  { %1992 = vmatprep.subr.mxu0 %v2253_v0 }
 0xb55   :  { %1993 = vmatpush3.msra.mxu0 %v1289_v61 }
 0xb56   :  { %1994 = vmatprep.subr.mxu0 %v2253_v0 }
 0xb57   :  { %1995 = vmatpush3.msra.mxu0 %v1288_v11 }
 0xb58   :  { %1996 = vmatprep.subr.mxu0 %v2253_v0 }
 0xb59   :  { %1997 = vmatpush3.msra.mxu0 %v1287_v12 }
 0xb5a   :  { %1998 = vmatprep.subr.mxu0 %v2253_v0 }
 0xb5b   :  { %1999 = vmatpush3.msra.mxu0 %v1286_v13 }
 0xb5c   :  { %2000 = vmatprep.subr.mxu0 %v2253_v0 }
 0xb5d   :  { %2001 = vmatpush3.msra.mxu0 %v1285_v15 }
 0xb5e   :  { %2002 = vmatprep.subr.mxu0 %v2253_v0 }
 0xb5f   :  { %2003 = vmatpush3.msra.mxu0 %v1284_v16 }
 0xb60   :  { %2004 = vmatprep.subr.mxu0 %v2253_v0 }
 0xb61   :  { %2005 = vmatpush3.msra.mxu0 %v1283_v20 }
 0xb62   :  { %2006 = vmatprep.subr.mxu0 %v2253_v0 }
 0xb63   :  { %2007 = vmatpush3.msra.mxu0 %v1282_v21 }
 0xb64   :  { %2008 = vmatprep.subr.mxu0 %v2253_v0 }
 0xb65   :  { %2009 = vmatpush3.msra.mxu0 %v1281_v22 }
 0xb66   :  { %2010 = vmatprep.subr.mxu0 %v2253_v0 }
 0xb67   :  { %2011 = vmatpush3.msra.mxu0 %v1280_v24 }
 0xc08   :  { %v1228_v32 = vpop.f32.mrf.mxu0 }
 0xc09   :  { %v1234_v45 = vadd.f32 %v1228_v32, %v867_v62 }
 0xc0a   :  { %v1958_v1 = vpop.f32.mrf.mxu0 }
 0xc0b   :  { %2089 = vtanh.f32 %v1234_v45 }
 0xc0c   :  { %v1231_v3 = vpop.f32.mrf.mxu0 }
 0xc0e   :  { %v1959_v5 = vpop.f32.mrf.mxu0 }
 0xc18   :  { %v2090_v7 = vpop.eup %2089 }
 0xc19   :  { %v1237_v9 = vpack.c.bf16 %v2090_v7, %v2090_v7 }
 0xc1b   :  { %1977 = vmatmul.mubr.bf16.vlgmr.msra.gmra.mxu1 %v1237_v9 }
 0xcdb   :  { %v1272_v4 = vpop.f32.mrf.mxu1 }
 0xcdc   :  { %v1278_v6 = vadd.f32 %v1272_v4, %v870_v2 }
 0xcdd   :  { %v1978_v8 = vpop.f32.mrf.mxu1 }
 0xcde   :  { %2091 = vtanh.f32 %v1278_v6 }
 0xcdf   :  { %v1275_v10 = vpop.f32.mrf.mxu1 }
 0xce1   :  { %v1979_v14 = vpop.f32.mrf.mxu1 }
 0xceb   :  { %v2092_v25 = vpop.eup %2091 }
 0xcec   :  { %2013 = vmatmul.mubr.f32.vlgmr.msra.gmra.mxu0 %v2092_v25 }
 0xdac   :  { %v1369_v27 = vpop.f32.mrf.mxu0 }
 0xdad   :  { %v1370_v0 = vadd.f32 %v1426_v26, %v1369_v27 }
 0xdae   :  { %v2014_v17 = vpop.f32.mrf.mxu0 }
 0xdaf   :  { %1373 = vst [vmem:[#allocation15] sm:$0xff] %v1370_v0 }
 0xdb0   :  { %2224 = shalt.err (!%p2221_p6)
}
 0xdb1   :  { %1383 = dma.vmem_to_hbm [thread:$0]  %s1381_s21, 128, %s2771_s9, [#allocation6]  }
 0xdb2   :  { %2241 = dma.done.wait [#allocation6], 128  }
 0xdb3   :  { %2242 = vsyncadd [#allocation6], 4294967168 }
 0xdb4   :  { %1387 = vsyncpa [#allocation5], 1 }
 0xdb5   :  { %1388 = vsyncpa [#allocation8], 1 }
 0xdb6   :  { %1389 = vsyncpa [#allocation11], 1 }
 0xdb7   :  { %1390 = vsyncpa [#allocation14], 1 }
 0xdb8   :  { %1391 = vsyncpa [#allocation6], 1 }

</bundles_post_ra>
